<compile_context>
chip_gen: v5e
topology: v5e:2x2
jax: 0.10.0
libtpu: 0.0.40
codegen_flags: <defaults>
</compile_context>

<pallas_src>
import functools
import math

import jax
import jax.numpy as jnp
from jax.experimental import pallas as pl
from jax.experimental.pallas import tpu as pltpu


def _round_up(x, m):
    return ((x + m - 1) // m) * m


# ----------------------------------------------------------------------------
# Pallas kernel: tiled C = act(A @ B + bias), bf16 operands, f32 accumulation.
# ----------------------------------------------------------------------------
def _gemm_bias_act_kernel(a_ref, b_ref, bias_ref, o_ref, acc_ref, *, act):
    k = pl.program_id(2)

    @pl.when(k == 0)
    def _():
        acc_ref[...] = jnp.zeros_like(acc_ref)

    acc_ref[...] += jnp.dot(a_ref[...], b_ref[...],
                            preferred_element_type=jnp.float32)

    @pl.when(k == pl.num_programs(2) - 1)
    def _():
        acc = acc_ref[...] + bias_ref[...]          # (tm, tn) + (1, tn)
        if act == "relu":
            acc = jnp.maximum(acc, 0.0)
        elif act == "sigmoid":
            acc = jax.nn.sigmoid(acc)
        o_ref[...] = acc.astype(o_ref.dtype)


def matmul_bias_act(a, b, bias=None, act="none", out_dtype=jnp.bfloat16,
                    tm_max=256, tn_max=512, tk_max=1024):
    """act(A @ B + bias) with a tiled, double-buffered Pallas GEMM."""
    M, K = a.shape
    K2, N = b.shape
    assert K == K2, (a.shape, b.shape)

    a = a.astype(jnp.bfloat16)
    b = b.astype(jnp.bfloat16)
    if bias is None:
        bias = jnp.zeros((N,), jnp.float32)
    bias = bias.astype(jnp.float32).reshape(1, N)

    # --- tile sizes (multiples of (16, 128) so bf16/f32 blocks are tile
    #     aligned; generation-safe VMEM footprint well under 16 MiB) ---------
    tm = min(tm_max, _round_up(M, 16))
    Mp = _round_up(M, tm)

    Np = _round_up(N, 128)
    if Np <= tn_max:
        tn = Np
    else:
        tn = 128
        for cand in range(tn_max, 127, -128):
            if Np % cand == 0:
                tn = cand
                break

    if K <= tk_max:
        tk, Kp = K, K
    else:
        tk = tk_max
        Kp = _round_up(K, tk)

    # --- zero-pad operands to the tile grid (no-op for aligned shapes) ------
    if (Mp, Kp) != (M, K):
        a = jnp.pad(a, ((0, Mp - M), (0, Kp - K)))
    if (Kp, Np) != (K, N):
        b = jnp.pad(b, ((0, Kp - K), (0, Np - N)))
    if Np != N:
        bias = jnp.pad(bias, ((0, 0), (0, Np - N)))

    grid = (Mp // tm, Np // tn, Kp // tk)

    out = pl.pallas_call(
        functools.partial(_gemm_bias_act_kernel, act=act),
        out_shape=jax.ShapeDtypeStruct((Mp, Np), out_dtype),
        grid_spec=pltpu.PrefetchScalarGridSpec(
            num_scalar_prefetch=0,
            grid=grid,
            in_specs=[
                pl.BlockSpec((tm, tk), lambda i, j, k: (i, k)),
                pl.BlockSpec((tk, tn), lambda i, j, k: (k, j)),
                pl.BlockSpec((1, tn), lambda i, j, k: (0, j)),
            ],
            out_specs=pl.BlockSpec((tm, tn), lambda i, j, k: (i, j)),
            scratch_shapes=[pltpu.VMEM((tm, tn), jnp.float32)],
        ),
        compiler_params=pltpu.CompilerParams(
            dimension_semantics=("parallel", "parallel", "arbitrary"),
            vmem_limit_bytes=32 * 1024 * 1024,
        ),
    )(a, b, bias)

    if (Mp, Np) != (M, N):
        out = out[:M, :N]
    return out


# ----------------------------------------------------------------------------
# ConvTranspose2d(Ci, Co, 4, 2, 1) + ReLU:  direct GEMM + col2im scatter-add.
# ----------------------------------------------------------------------------
def conv_transpose2d_gemm(x, wmat, bias, cout, kh=4, kw=4, stride=2, padding=1):
    """x: (B, H, W, Ci) NHWC.  wmat: (Ci, kh*kw*cout) precomputed at init."""
    B, H, W, Ci = x.shape
    Ho = (H - 1) * stride - 2 * padding + kh
    Wo = (W - 1) * stride - 2 * padding + kw

    # Lane-dense GEMM: N = kh*kw*cout.  Bias/ReLU are applied after col2im.
    g = matmul_bias_act(x.reshape(B * H * W, Ci), wmat,
                        bias=None, act="none", out_dtype=jnp.bfloat16)
    g = g.reshape(B, H, W, kh, kw, cout).astype(jnp.float32)

    # col2im scatter-add (static strided slices -> cheap XLA glue).
    out = jnp.zeros((B, Ho, Wo, cout), jnp.float32)
    for ih in range(kh):
        oh0 = ih - padding
        h_lo = max(0, -(oh0 // stride))
        h_hi = min(H - 1, (Ho - 1 - oh0) // stride)
        if h_hi < h_lo:
            continue
        for iw in range(kw):
            ow0 = iw - padding
            w_lo = max(0, -(ow0 // stride))
            w_hi = min(W - 1, (Wo - 1 - ow0) // stride)
            if w_hi < w_lo:
                continue
            out = out.at[:,
                         oh0 + stride * h_lo: oh0 + stride * h_hi + 1: stride,
                         ow0 + stride * w_lo: ow0 + stride * w_hi + 1: stride,
                         :].add(g[:, h_lo:h_hi + 1, w_lo:w_hi + 1, ih, iw, :])

    return jnp.maximum(out + bias, 0.0).astype(jnp.bfloat16)


# ----------------------------------------------------------------------------
# Final Conv2d(16, image_channels, 3, 1, 1) + sigmoid, lane-padded output.
# ----------------------------------------------------------------------------
def conv2d_3x3_sigmoid(x, wmat_padded, bias_padded, cout):
    """x: (B, H, W, Ci) bf16.  wmat_padded: (9*Ci, 128) with zero lanes > cout."""
    B, H, W, Ci = x.shape
    xp = jnp.pad(x, ((0, 0), (1, 1), (1, 1), (0, 0)))
    # TODO(synk): for large image_size, gather the 3x3 taps inside the kernel
    # (per-tap dot accumulation on overlapping NHWC blocks) instead of
    # materializing this (tiny, 9x) im2col patch matrix in XLA.
    cols = [xp[:, i:i + H, j:j + W, :] for i in range(3) for j in range(3)]
    patches = jnp.concatenate(cols, axis=-1).reshape(B * H * W, 9 * Ci)
    out = matmul_bias_act(patches, wmat_padded, bias_padded,
                          act="sigmoid", out_dtype=jnp.float32)
    return out.reshape(B, H, W, -1)[..., :cout]


# ----------------------------------------------------------------------------
# Decoder: synthetic parameters (PyTorch layouts -> GEMM layouts at init).
# ----------------------------------------------------------------------------
def init_decoder_params(key, image_size, image_channels, latent_dim):
    down = 4
    num_layer = int(math.log2(image_size) - math.log2(down))
    base_channels = 2 ** min(4 + num_layer, 9)

    k = key

    def nxt():
        nonlocal k
        k, sub = jax.random.split(k)
        return sub

    params = {"meta": (down, base_channels, num_layer)}

    # fc: nn.Linear(latent_dim, 16 * base_channels).  Columns are permuted so
    # the fc output is directly the NHWC (B,4,4,C) activation:
    # torch .view(B,C,4,4) flat index c*16+h*4+w  ->  (h*4+w)*C+c.
    fc_out = down * down * base_channels
    w_pt = 0.05 * jax.random.normal(nxt(), (fc_out, latent_dim), jnp.float32)
    b_pt = 0.05 * jax.random.normal(nxt(), (fc_out,), jnp.float32)
    w_io = jnp.transpose(
        w_pt.T.reshape(latent_dim, base_channels, down, down), (0, 2, 3, 1)
    ).reshape(latent_dim, fc_out)
    b_nhwc = jnp.transpose(
        b_pt.reshape(base_channels, down, down), (1, 2, 0)).reshape(fc_out)
    params["fc_w"] = w_io.astype(jnp.bfloat16)
    params["fc_b"] = b_nhwc

    # ConvTranspose2d(2*nc, nc, 4, 2, 1) + ReLU blocks.
    # PyTorch weight layout (Ci, Co, Kh, Kw) -> GEMM matrix (Ci, Kh*Kw*Co).
    convts = []
    for i in reversed(range(num_layer)):
        nc = 2 ** min(4 + i, 9)
        cin, cout = nc * 2, nc
        w_pt = 0.05 * jax.random.normal(nxt(), (cin, cout, 4, 4), jnp.float32)
        b = 0.05 * jax.random.normal(nxt(), (cout,), jnp.float32)
        wmat = jnp.transpose(w_pt, (0, 2, 3, 1)).reshape(cin, 16 * cout)
        convts.append({"wmat": wmat.astype(jnp.bfloat16), "bias": b,
                       "cout": cout})
    params["convts"] = convts

    # Final Conv2d(16, image_channels, 3, 1, 1): im2col weight (9*16, Co),
    # lane-padded to 128 output channels so stores are full vregs.
    COP = 128
    w_pt = 0.05 * jax.random.normal(
        nxt(), (image_channels, 16, 3, 3), jnp.float32)
    b = 0.05 * jax.random.normal(nxt(), (image_channels,), jnp.float32)
    wmat = jnp.transpose(w_pt, (2, 3, 1, 0)).reshape(9 * 16, image_channels)
    params["conv_wmat"] = jnp.pad(
        wmat, ((0, 0), (0, COP - image_channels))).astype(jnp.bfloat16)
    params["conv_b"] = jnp.pad(b, (0, COP - image_channels))
    params["conv_cout"] = image_channels
    return params


def decoder_forward(params, x):
    down, base_channels, _ = params["meta"]
    B = x.shape[0]

    # fc + ReLU (Pallas GEMM); output columns are already in NHWC order.
    h = matmul_bias_act(x, params["fc_w"], params["fc_b"],
                        act="relu", out_dtype=jnp.bfloat16)
    h = h.reshape(B, down, down, base_channels)

    # ConvTranspose2d(...,4,2,1) + ReLU blocks (each one Pallas GEMM + col2im).
    for layer in params["convts"]:
        h = conv_transpose2d_gemm(h, layer["wmat"], layer["bias"],
                                  cout=layer["cout"],
                                  kh=4, kw=4, stride=2, padding=1)

    # Final Conv2d(16, C, 3, 1, 1) with fused sigmoid (lane-padded GEMM).
    y = conv2d_3x3_sigmoid(h, params["conv_wmat"], params["conv_b"],
                           cout=params["conv_cout"])

    # NHWC -> NCHW to match the PyTorch output convention.
    return jnp.transpose(y, (0, 3, 1, 2))


if __name__ == "__main__":
    image_size, image_channels, latent_dim = 16, 3, 32
    batch = 2

    key = jax.random.PRNGKey(0)
    kp, kx = jax.random.split(key)
    params = init_decoder_params(kp, image_size, image_channels, latent_dim)
    x = jax.random.normal(kx, (batch, latent_dim), jnp.float32)

    fwd = jax.jit(lambda v: decoder_forward(params, v))
    y = fwd(x)
    jax.block_until_ready(y)

    assert y.shape == (batch, image_channels, image_size, image_size), y.shape
    assert bool(jnp.all((y >= 0.0) & (y <= 1.0)))   # sigmoid output range
    print("KERNEL_OK")
</pallas_src>

<mosaic_0001>
module attributes {stable_mosaic.version = 11 : i64} {
  func.func @_gemm_bias_act_kernel(%arg0: i32, %arg1: i32, %arg2: i32, %arg3: memref<16x32xbf16, #tpu.memory_space<vmem>>, %arg4: memref<32x512xbf16, #tpu.memory_space<vmem>>, %arg5: memref<1x512xf32, #tpu.memory_space<vmem>>, %arg6: memref<16x512xbf16, #tpu.memory_space<vmem>>, %arg7: memref<16x512xf32, #tpu.memory_space<vmem>>) attributes {dimension_semantics = [#tpu.dimension_semantics<parallel>, #tpu.dimension_semantics<parallel>, #tpu.dimension_semantics<arbitrary>], iteration_bounds = array<i64: 1, 2, 1>, scalar_prefetch = 0 : i64, scratch_operands = 1 : i64, tpu.core_type = #tpu.core_type<tc>, window_params = [{transform_indices = @transform_0, window_bounds = array<i64: 16, 32>}, {transform_indices = @transform_1, window_bounds = array<i64: 32, 512>}, {transform_indices = @transform_2, window_bounds = array<i64: 1, 512>}, {transform_indices = @transform_3, window_bounds = array<i64: 16, 512>}]} {
    %c0_i32 = arith.constant 0 : i32
    %0 = arith.cmpi eq, %arg2, %c0_i32 : i32
    %1 = arith.extui %0 : i1 to i32
    %c0_i32_0 = arith.constant 0 : i32
    %2 = arith.cmpi ne, %1, %c0_i32_0 : i32
    scf.if %2 {
      %cst_10 = arith.constant 0.000000e+00 : f32
      %12 = vector.broadcast %cst_10 : f32 to vector<16x512xf32>
      %c0_11 = arith.constant 0 : index
      %c0_12 = arith.constant 0 : index
      %13 = vector.load %arg7[%c0_11, %c0_12] : memref<16x512xf32, #tpu.memory_space<vmem>>, vector<16x512xf32>
      tpu.vector_store %arg7[%c0_11, %c0_12], %12 {strides = array<i32>} : memref<16x512xf32, #tpu.memory_space<vmem>>, vector<16x512xf32>,
    } else {
    }
    %c0 = arith.constant 0 : index
    %c0_1 = arith.constant 0 : index
    %3 = vector.load %arg7[%c0, %c0_1] : memref<16x512xf32, #tpu.memory_space<vmem>>, vector<16x512xf32>
    %c0_2 = arith.constant 0 : index
    %c0_3 = arith.constant 0 : index
    %4 = vector.load %arg3[%c0_2, %c0_3] : memref<16x32xbf16, #tpu.memory_space<vmem>>, vector<16x32xbf16>
    %c0_4 = arith.constant 0 : index
    %c0_5 = arith.constant 0 : index
    %5 = vector.load %arg4[%c0_4, %c0_5] : memref<32x512xbf16, #tpu.memory_space<vmem>>, vector<32x512xbf16>
    %cst = arith.constant dense<0.000000e+00> : vector<16x512xf32>
    %6 = tpu.matmul %4, %5, %cst {dimension_numbers = #tpu.dot_dimension_numbers<[1], [0], [0], [1], [0, 0, 1, 1], [], []>} : vector<16x32xbf16>, vector<32x512xbf16>, vector<16x512xf32> -> vector<16x512xf32>
    %7 = arith.addf %3, %6 : vector<16x512xf32>
    %c0_6 = arith.constant 0 : index
    %c0_7 = arith.constant 0 : index
    %8 = vector.load %arg7[%c0_6, %c0_7] : memref<16x512xf32, #tpu.memory_space<vmem>>, vector<16x512xf32>
    tpu.vector_store %arg7[%c0_6, %c0_7], %7 {strides = array<i32>} : memref<16x512xf32, #tpu.memory_space<vmem>>, vector<16x512xf32>,
    %c0_i32_8 = arith.constant 0 : i32
    %9 = arith.cmpi eq, %arg2, %c0_i32_8 : i32
    %10 = arith.extui %9 : i1 to i32
    %c0_i32_9 = arith.constant 0 : i32
    %11 = arith.cmpi ne, %10, %c0_i32_9 : i32
    scf.if %11 {
      %c0_10 = arith.constant 0 : index
      %c0_11 = arith.constant 0 : index
      %12 = vector.load %arg7[%c0_10, %c0_11] : memref<16x512xf32, #tpu.memory_space<vmem>>, vector<16x512xf32>
      %c0_12 = arith.constant 0 : index
      %c0_13 = arith.constant 0 : index
      %13 = vector.load %arg5[%c0_12, %c0_13] : memref<1x512xf32, #tpu.memory_space<vmem>>, vector<1x512xf32>
      %14 = vector.broadcast %13 : vector<1x512xf32> to vector<16x512xf32>
      %15 = arith.addf %12, %14 : vector<16x512xf32>
      %cst_14 = arith.constant 0.000000e+00 : f32
      %16 = vector.broadcast %cst_14 : f32 to vector<16x512xf32>
      %17 = arith.maximumf %15, %16 : vector<16x512xf32>
      %18 = arith.truncf %17 : vector<16x512xf32> to vector<16x512xbf16>
      %c0_15 = arith.constant 0 : index
      %c0_16 = arith.constant 0 : index
      %19 = vector.load %arg6[%c0_15, %c0_16] : memref<16x512xbf16, #tpu.memory_space<vmem>>, vector<16x512xbf16>
      tpu.vector_store %arg6[%c0_15, %c0_16], %18 {strides = array<i32>} : memref<16x512xbf16, #tpu.memory_space<vmem>>, vector<16x512xbf16>,
    } else {
    }
    return
  }
  func.func @transform_0(%arg0: i32, %arg1: i32, %arg2: i32) -> (i32, i32) {
    %c0_i32 = arith.constant 0 : i32
    return %arg0, %arg2 : i32, i32
  }
  func.func @transform_1(%arg0: i32, %arg1: i32, %arg2: i32) -> (i32, i32) {
    %c0_i32 = arith.constant 0 : i32
    return %arg2, %arg1 : i32, i32
  }
  func.func @transform_2(%arg0: i32, %arg1: i32, %arg2: i32) -> (i32, i32) {
    %c0_i32 = arith.constant 0 : i32
    %c0_i32_0 = arith.constant 0 : i32
    return %c0_i32, %arg1 : i32, i32
  }
  func.func @transform_3(%arg0: i32, %arg1: i32, %arg2: i32) -> (i32, i32) {
    %c0_i32 = arith.constant 0 : i32
    return %arg0, %arg1 : i32, i32
  }
}

module attributes {stable_mosaic.version = 11 : i64} {
  func.func @_gemm_bias_act_kernel(%arg0: i32, %arg1: i32, %arg2: i32, %arg3: memref<32x64xbf16, #tpu.memory_space<vmem>>, %arg4: memref<64x512xbf16, #tpu.memory_space<vmem>>, %arg5: memref<1x512xf32, #tpu.memory_space<vmem>>, %arg6: memref<32x512xbf16, #tpu.memory_space<vmem>>, %arg7: memref<32x512xf32, #tpu.memory_space<vmem>>) attributes {dimension_semantics = [#tpu.dimension_semantics<parallel>, #tpu.dimension_semantics<parallel>, #tpu.dimension_semantics<arbitrary>], iteration_bounds = array<i64: 1, 1, 1>, scalar_prefetch = 0 : i64, scratch_operands = 1 : i64, tpu.core_type = #tpu.core_type<tc>, window_params = [{transform_indices = @transform_0, window_bounds = array<i64: 32, 64>}, {transform_indices = @transform_1, window_bounds = array<i64: 64, 512>}, {transform_indices = @transform_2, window_bounds = array<i64: 1, 512>}, {transform_indices = @transform_3, window_bounds = array<i64: 32, 512>}]} {
    %c0_i32 = arith.constant 0 : i32
    %0 = arith.cmpi eq, %arg2, %c0_i32 : i32
    %1 = arith.extui %0 : i1 to i32
    %c0_i32_0 = arith.constant 0 : i32
    %2 = arith.cmpi ne, %1, %c0_i32_0 : i32
    scf.if %2 {
      %cst_10 = arith.constant 0.000000e+00 : f32
      %12 = vector.broadcast %cst_10 : f32 to vector<32x512xf32>
      %c0_11 = arith.constant 0 : index
      %c0_12 = arith.constant 0 : index
      %13 = vector.load %arg7[%c0_11, %c0_12] : memref<32x512xf32, #tpu.memory_space<vmem>>, vector<32x512xf32>
      tpu.vector_store %arg7[%c0_11, %c0_12], %12 {strides = array<i32>} : memref<32x512xf32, #tpu.memory_space<vmem>>, vector<32x512xf32>,
    } else {
    }
    %c0 = arith.constant 0 : index
    %c0_1 = arith.constant 0 : index
    %3 = vector.load %arg7[%c0, %c0_1] : memref<32x512xf32, #tpu.memory_space<vmem>>, vector<32x512xf32>
    %c0_2 = arith.constant 0 : index
    %c0_3 = arith.constant 0 : index
    %4 = vector.load %arg3[%c0_2, %c0_3] : memref<32x64xbf16, #tpu.memory_space<vmem>>, vector<32x64xbf16>
    %c0_4 = arith.constant 0 : index
    %c0_5 = arith.constant 0 : index
    %5 = vector.load %arg4[%c0_4, %c0_5] : memref<64x512xbf16, #tpu.memory_space<vmem>>, vector<64x512xbf16>
    %cst = arith.constant dense<0.000000e+00> : vector<32x512xf32>
    %6 = tpu.matmul %4, %5, %cst {dimension_numbers = #tpu.dot_dimension_numbers<[1], [0], [0], [1], [0, 0, 1, 1], [], []>} : vector<32x64xbf16>, vector<64x512xbf16>, vector<32x512xf32> -> vector<32x512xf32>
    %7 = arith.addf %3, %6 : vector<32x512xf32>
    %c0_6 = arith.constant 0 : index
    %c0_7 = arith.constant 0 : index
    %8 = vector.load %arg7[%c0_6, %c0_7] : memref<32x512xf32, #tpu.memory_space<vmem>>, vector<32x512xf32>
    tpu.vector_store %arg7[%c0_6, %c0_7], %7 {strides = array<i32>} : memref<32x512xf32, #tpu.memory_space<vmem>>, vector<32x512xf32>,
    %c0_i32_8 = arith.constant 0 : i32
    %9 = arith.cmpi eq, %arg2, %c0_i32_8 : i32
    %10 = arith.extui %9 : i1 to i32
    %c0_i32_9 = arith.constant 0 : i32
    %11 = arith.cmpi ne, %10, %c0_i32_9 : i32
    scf.if %11 {
      %c0_10 = arith.constant 0 : index
      %c0_11 = arith.constant 0 : index
      %12 = vector.load %arg7[%c0_10, %c0_11] : memref<32x512xf32, #tpu.memory_space<vmem>>, vector<32x512xf32>
      %c0_12 = arith.constant 0 : index
      %c0_13 = arith.constant 0 : index
      %13 = vector.load %arg5[%c0_12, %c0_13] : memref<1x512xf32, #tpu.memory_space<vmem>>, vector<1x512xf32>
      %14 = vector.broadcast %13 : vector<1x512xf32> to vector<32x512xf32>
      %15 = arith.addf %12, %14 : vector<32x512xf32>
      %16 = arith.truncf %15 : vector<32x512xf32> to vector<32x512xbf16>
      %c0_14 = arith.constant 0 : index
      %c0_15 = arith.constant 0 : index
      %17 = vector.load %arg6[%c0_14, %c0_15] : memref<32x512xbf16, #tpu.memory_space<vmem>>, vector<32x512xbf16>
      tpu.vector_store %arg6[%c0_14, %c0_15], %16 {strides = array<i32>} : memref<32x512xbf16, #tpu.memory_space<vmem>>, vector<32x512xbf16>,
    } else {
    }
    return
  }
  func.func @transform_0(%arg0: i32, %arg1: i32, %arg2: i32) -> (i32, i32) {
    %c0_i32 = arith.constant 0 : i32
    return %arg0, %arg2 : i32, i32
  }
  func.func @transform_1(%arg0: i32, %arg1: i32, %arg2: i32) -> (i32, i32) {
    %c0_i32 = arith.constant 0 : i32
    return %arg2, %arg1 : i32, i32
  }
  func.func @transform_2(%arg0: i32, %arg1: i32, %arg2: i32) -> (i32, i32) {
    %c0_i32 = arith.constant 0 : i32
    %c0_i32_0 = arith.constant 0 : i32
    return %c0_i32, %arg1 : i32, i32
  }
  func.func @transform_3(%arg0: i32, %arg1: i32, %arg2: i32) -> (i32, i32) {
    %c0_i32 = arith.constant 0 : i32
    return %arg0, %arg1 : i32, i32
  }
}

module attributes {stable_mosaic.version = 11 : i64} {
  func.func @_gemm_bias_act_kernel(%arg0: i32, %arg1: i32, %arg2: i32, %arg3: memref<128x32xbf16, #tpu.memory_space<vmem>>, %arg4: memref<32x256xbf16, #tpu.memory_space<vmem>>, %arg5: memref<1x256xf32, #tpu.memory_space<vmem>>, %arg6: memref<128x256xbf16, #tpu.memory_space<vmem>>, %arg7: memref<128x256xf32, #tpu.memory_space<vmem>>) attributes {dimension_semantics = [#tpu.dimension_semantics<parallel>, #tpu.dimension_semantics<parallel>, #tpu.dimension_semantics<arbitrary>], iteration_bounds = array<i64: 1, 1, 1>, scalar_prefetch = 0 : i64, scratch_operands = 1 : i64, tpu.core_type = #tpu.core_type<tc>, window_params = [{transform_indices = @transform_0, window_bounds = array<i64: 128, 32>}, {transform_indices = @transform_1, window_bounds = array<i64: 32, 256>}, {transform_indices = @transform_2, window_bounds = array<i64: 1, 256>}, {transform_indices = @transform_3, window_bounds = array<i64: 128, 256>}]} {
    %c0_i32 = arith.constant 0 : i32
    %0 = arith.cmpi eq, %arg2, %c0_i32 : i32
    %1 = arith.extui %0 : i1 to i32
    %c0_i32_0 = arith.constant 0 : i32
    %2 = arith.cmpi ne, %1, %c0_i32_0 : i32
    scf.if %2 {
      %cst_10 = arith.constant 0.000000e+00 : f32
      %12 = vector.broadcast %cst_10 : f32 to vector<128x256xf32>
      %c0_11 = arith.constant 0 : index
      %c0_12 = arith.constant 0 : index
      %13 = vector.load %arg7[%c0_11, %c0_12] : memref<128x256xf32, #tpu.memory_space<vmem>>, vector<128x256xf32>
      tpu.vector_store %arg7[%c0_11, %c0_12], %12 {strides = array<i32>} : memref<128x256xf32, #tpu.memory_space<vmem>>, vector<128x256xf32>,
    } else {
    }
    %c0 = arith.constant 0 : index
    %c0_1 = arith.constant 0 : index
    %3 = vector.load %arg7[%c0, %c0_1] : memref<128x256xf32, #tpu.memory_space<vmem>>, vector<128x256xf32>
    %c0_2 = arith.constant 0 : index
    %c0_3 = arith.constant 0 : index
    %4 = vector.load %arg3[%c0_2, %c0_3] : memref<128x32xbf16, #tpu.memory_space<vmem>>, vector<128x32xbf16>
    %c0_4 = arith.constant 0 : index
    %c0_5 = arith.constant 0 : index
    %5 = vector.load %arg4[%c0_4, %c0_5] : memref<32x256xbf16, #tpu.memory_space<vmem>>, vector<32x256xbf16>
    %cst = arith.constant dense<0.000000e+00> : vector<128x256xf32>
    %6 = tpu.matmul %4, %5, %cst {dimension_numbers = #tpu.dot_dimension_numbers<[1], [0], [0], [1], [0, 0, 1, 1], [], []>} : vector<128x32xbf16>, vector<32x256xbf16>, vector<128x256xf32> -> vector<128x256xf32>
    %7 = arith.addf %3, %6 : vector<128x256xf32>
    %c0_6 = arith.constant 0 : index
    %c0_7 = arith.constant 0 : index
    %8 = vector.load %arg7[%c0_6, %c0_7] : memref<128x256xf32, #tpu.memory_space<vmem>>, vector<128x256xf32>
    tpu.vector_store %arg7[%c0_6, %c0_7], %7 {strides = array<i32>} : memref<128x256xf32, #tpu.memory_space<vmem>>, vector<128x256xf32>,
    %c0_i32_8 = arith.constant 0 : i32
    %9 = arith.cmpi eq, %arg2, %c0_i32_8 : i32
    %10 = arith.extui %9 : i1 to i32
    %c0_i32_9 = arith.constant 0 : i32
    %11 = arith.cmpi ne, %10, %c0_i32_9 : i32
    scf.if %11 {
      %c0_10 = arith.constant 0 : index
      %c0_11 = arith.constant 0 : index
      %12 = vector.load %arg7[%c0_10, %c0_11] : memref<128x256xf32, #tpu.memory_space<vmem>>, vector<128x256xf32>
      %c0_12 = arith.constant 0 : index
      %c0_13 = arith.constant 0 : index
      %13 = vector.load %arg5[%c0_12, %c0_13] : memref<1x256xf32, #tpu.memory_space<vmem>>, vector<1x256xf32>
      %14 = vector.broadcast %13 : vector<1x256xf32> to vector<128x256xf32>
      %15 = arith.addf %12, %14 : vector<128x256xf32>
      %16 = arith.truncf %15 : vector<128x256xf32> to vector<128x256xbf16>
      %c0_14 = arith.constant 0 : index
      %c0_15 = arith.constant 0 : index
      %17 = vector.load %arg6[%c0_14, %c0_15] : memref<128x256xbf16, #tpu.memory_space<vmem>>, vector<128x256xbf16>
      tpu.vector_store %arg6[%c0_14, %c0_15], %16 {strides = array<i32>} : memref<128x256xbf16, #tpu.memory_space<vmem>>, vector<128x256xbf16>,
    } else {
    }
    return
  }
  func.func @transform_0(%arg0: i32, %arg1: i32, %arg2: i32) -> (i32, i32) {
    %c0_i32 = arith.constant 0 : i32
    return %arg0, %arg2 : i32, i32
  }
  func.func @transform_1(%arg0: i32, %arg1: i32, %arg2: i32) -> (i32, i32) {
    %c0_i32 = arith.constant 0 : i32
    return %arg2, %arg1 : i32, i32
  }
  func.func @transform_2(%arg0: i32, %arg1: i32, %arg2: i32) -> (i32, i32) {
    %c0_i32 = arith.constant 0 : i32
    %c0_i32_0 = arith.constant 0 : i32
    return %c0_i32, %arg1 : i32, i32
  }
  func.func @transform_3(%arg0: i32, %arg1: i32, %arg2: i32) -> (i32, i32) {
    %c0_i32 = arith.constant 0 : i32
    return %arg0, %arg1 : i32, i32
  }
}

module attributes {stable_mosaic.version = 11 : i64} {
  func.func @_gemm_bias_act_kernel(%arg0: i32, %arg1: i32, %arg2: i32, %arg3: memref<256x144xbf16, #tpu.memory_space<vmem>>, %arg4: memref<144x128xbf16, #tpu.memory_space<vmem>>, %arg5: memref<1x128xf32, #tpu.memory_space<vmem>>, %arg6: memref<256x128xf32, #tpu.memory_space<vmem>>, %arg7: memref<256x128xf32, #tpu.memory_space<vmem>>) attributes {dimension_semantics = [#tpu.dimension_semantics<parallel>, #tpu.dimension_semantics<parallel>, #tpu.dimension_semantics<arbitrary>], iteration_bounds = array<i64: 2, 1, 1>, scalar_prefetch = 0 : i64, scratch_operands = 1 : i64, tpu.core_type = #tpu.core_type<tc>, window_params = [{transform_indices = @transform_0, window_bounds = array<i64: 256, 144>}, {transform_indices = @transform_1, window_bounds = array<i64: 144, 128>}, {transform_indices = @transform_2, window_bounds = array<i64: 1, 128>}, {transform_indices = @transform_3, window_bounds = array<i64: 256, 128>}]} {
    %c0_i32 = arith.constant 0 : i32
    %0 = arith.cmpi eq, %arg2, %c0_i32 : i32
    %1 = arith.extui %0 : i1 to i32
    %c0_i32_0 = arith.constant 0 : i32
    %2 = arith.cmpi ne, %1, %c0_i32_0 : i32
    scf.if %2 {
      %cst_10 = arith.constant 0.000000e+00 : f32
      %12 = vector.broadcast %cst_10 : f32 to vector<256x128xf32>
      %c0_11 = arith.constant 0 : index
      %c0_12 = arith.constant 0 : index
      %13 = vector.load %arg7[%c0_11, %c0_12] : memref<256x128xf32, #tpu.memory_space<vmem>>, vector<256x128xf32>
      tpu.vector_store %arg7[%c0_11, %c0_12], %12 {strides = array<i32>} : memref<256x128xf32, #tpu.memory_space<vmem>>, vector<256x128xf32>,
    } else {
    }
    %c0 = arith.constant 0 : index
    %c0_1 = arith.constant 0 : index
    %3 = vector.load %arg7[%c0, %c0_1] : memref<256x128xf32, #tpu.memory_space<vmem>>, vector<256x128xf32>
    %c0_2 = arith.constant 0 : index
    %c0_3 = arith.constant 0 : index
    %4 = vector.load %arg3[%c0_2, %c0_3] : memref<256x144xbf16, #tpu.memory_space<vmem>>, vector<256x144xbf16>
    %c0_4 = arith.constant 0 : index
    %c0_5 = arith.constant 0 : index
    %5 = vector.load %arg4[%c0_4, %c0_5] : memref<144x128xbf16, #tpu.memory_space<vmem>>, vector<144x128xbf16>
    %cst = arith.constant dense<0.000000e+00> : vector<256x128xf32>
    %6 = tpu.matmul %4, %5, %cst {dimension_numbers = #tpu.dot_dimension_numbers<[1], [0], [0], [1], [0, 0, 1, 1], [], []>} : vector<256x144xbf16>, vector<144x128xbf16>, vector<256x128xf32> -> vector<256x128xf32>
    %7 = arith.addf %3, %6 : vector<256x128xf32>
    %c0_6 = arith.constant 0 : index
    %c0_7 = arith.constant 0 : index
    %8 = vector.load %arg7[%c0_6, %c0_7] : memref<256x128xf32, #tpu.memory_space<vmem>>, vector<256x128xf32>
    tpu.vector_store %arg7[%c0_6, %c0_7], %7 {strides = array<i32>} : memref<256x128xf32, #tpu.memory_space<vmem>>, vector<256x128xf32>,
    %c0_i32_8 = arith.constant 0 : i32
    %9 = arith.cmpi eq, %arg2, %c0_i32_8 : i32
    %10 = arith.extui %9 : i1 to i32
    %c0_i32_9 = arith.constant 0 : i32
    %11 = arith.cmpi ne, %10, %c0_i32_9 : i32
    scf.if %11 {
      %c0_10 = arith.constant 0 : index
      %c0_11 = arith.constant 0 : index
      %12 = vector.load %arg7[%c0_10, %c0_11] : memref<256x128xf32, #tpu.memory_space<vmem>>, vector<256x128xf32>
      %c0_12 = arith.constant 0 : index
      %c0_13 = arith.constant 0 : index
      %13 = vector.load %arg5[%c0_12, %c0_13] : memref<1x128xf32, #tpu.memory_space<vmem>>, vector<1x128xf32>
      %14 = vector.broadcast %13 : vector<1x128xf32> to vector<256x128xf32>
      %15 = arith.addf %12, %14 : vector<256x128xf32>
      %16 = arith.negf %15 : vector<256x128xf32>
      %17 = math.exp %16 : vector<256x128xf32>
      %cst_14 = arith.constant 1.000000e+00 : f32
      %18 = vector.broadcast %cst_14 : f32 to vector<256x128xf32>
      %19 = arith.addf %18, %17 : vector<256x128xf32>
      %20 = arith.divf %18, %19 : vector<256x128xf32>
      %c0_15 = arith.constant 0 : index
      %c0_16 = arith.constant 0 : index
      %21 = vector.load %arg6[%c0_15, %c0_16] : memref<256x128xf32, #tpu.memory_space<vmem>>, vector<256x128xf32>
      tpu.vector_store %arg6[%c0_15, %c0_16], %20 {strides = array<i32>} : memref<256x128xf32, #tpu.memory_space<vmem>>, vector<256x128xf32>,
    } else {
    }
    return
  }
  func.func @transform_0(%arg0: i32, %arg1: i32, %arg2: i32) -> (i32, i32) {
    %c0_i32 = arith.constant 0 : i32
    return %arg0, %arg2 : i32, i32
  }
  func.func @transform_1(%arg0: i32, %arg1: i32, %arg2: i32) -> (i32, i32) {
    %c0_i32 = arith.constant 0 : i32
    return %arg2, %arg1 : i32, i32
  }
  func.func @transform_2(%arg0: i32, %arg1: i32, %arg2: i32) -> (i32, i32) {
    %c0_i32 = arith.constant 0 : i32
    %c0_i32_0 = arith.constant 0 : i32
    return %c0_i32, %arg1 : i32, i32
  }
  func.func @transform_3(%arg0: i32, %arg1: i32, %arg2: i32) -> (i32, i32) {
    %c0_i32 = arith.constant 0 : i32
    return %arg0, %arg1 : i32, i32
  }
}

</mosaic_0001>

<bundles_post_ra>
// kernel: _lambda_.5
= control target key start
LH: loop header
LB: loop body
LE: loop exit
PB: predicated region body
PF: predicated region fallthrough
CT: control target
= control target key end

     0   :  { %8 = vsyncpa [#allocation4], 0  ;;  %s485_s15 = smov [#allocation3]   ;;  %s486_s17 = smov 256   ;;  %s544_s0 = inlined_call_operand.vmem [shape: bf16[32,64], index: 0, kind: input, shape index: {}]   ;;  %s545_s1 = inlined_call_operand.hbm [shape: bf16[64,512], index: 1, kind: input, shape index: {}]   ;;  %s546_s2 = inlined_call_operand.vmem [shape: f32[1,512], index: 2, kind: input, shape index: {}]   ;;  %s547_s3 = inlined_call_operand.vmem [shape: bf16[32,512], index: 3, kind: output, shape index: {}]  }
   0x1   :  { %s15_s14 = sshll.u32 %s545_s1, 4  ;;  %s17_s16 = sshll.u32 %s485_s15, 4  ;;  %s16_s14 = int_to_ptr.hbm [resolvable:$true] %s15_s14  ;;  %s18_s16 = int_to_ptr.vmem [resolvable:$true] %s17_s16 }
   0x2   :  { %s487_s18 = smov 16  }
   0x3   :  { %23 = dma.hbm_to_vmem [thread:$0]  %s16_s14, 2048, %s18_s16, [#allocation4], %s486_s17, %s486_s17, %s487_s18  }
   0x4   :  { %483 = dma.done.wait [#allocation4], 2048  }
   0x5   :  { %484 = vsyncadd [#allocation4], 4294965248  ;;  %v416_v0 = vld [vmem:[#allocation3 + $0x60] sm:$0xf]  ;;  %v454_v1 = vld [vmem:[#allocation3 + $0x6c] sm:$0xf0] }
   0x6   :  { %v452_v2 = vld [vmem:[#allocation3 + $0x64] sm:$0xf]  ;;  %v417_v3 = vor.u32 %v454_v1, %v416_v0  ;;  %v418_v4 = vld [vmem:[#allocation3 + $0x70] sm:$0xf0]  ;;  %v424_v5 = vld [vmem:[#allocation3 + $0x68] sm:$0xf] }
   0x7   :  { %v455_v6 = vld [vmem:[#allocation3 + $0x74] sm:$0xf0]  ;;  %v421_v7 = vor.u32 %v452_v2, %v418_v4  ;;  %v453_v9 = vld [vmem:[#allocation3 + $0x6c] sm:$0xf]  ;;  %v426_v10 = vld [vmem:[#allocation3 + $0x78] sm:$0xf0] }
   0x8   :  { %v425_v8 = vor.u32 %v455_v6, %v424_v5  ;;  %v400_v11 = vld [vmem:[#allocation3 + $0x40] sm:$0xf]  ;;  %188 = vmatpush.bf16.msra.mxu0 %v417_v3  ;;  %v429_v12 = vor.u32 %v453_v9, %v426_v10  ;;  %v450_v13 = vld [vmem:[#allocation3 + $0x4c] sm:$0xf0]  ;;  %v448_v14 = vld [vmem:[#allocation3 + $0x44] sm:$0xf] }
   0x9   :  { %v402_v15 = vld [vmem:[#allocation3 + $0x50] sm:$0xf0]  ;;  %207 = vmatpush.bf16.msra.mxu1 %v421_v7  ;;  %v401_v16 = vor.u32 %v450_v13, %v400_v11  ;;  %v408_v18 = vld [vmem:[#allocation3 + $0x48] sm:$0xf]  ;;  %v451_v19 = vld [vmem:[#allocation3 + $0x54] sm:$0xf0] }
   0xa   :  { %226 = vmatpush.bf16.msra.mxu2 %v425_v8  ;;  %v405_v17 = vor.u32 %v448_v14, %v402_v15  ;;  %v449_v20 = vld [vmem:[#allocation3 + $0x4c] sm:$0xf]  ;;  %245 = vmatpush.bf16.msra.mxu3 %v429_v12  ;;  %v409_v21 = vor.u32 %v451_v19, %v408_v18  ;;  %v410_v22 = vld [vmem:[#allocation3 + $0x58] sm:$0xf0]  ;;  %v384_v23 = vld [vmem:[#allocation3 + $0x20] sm:$0xf] }
   0xb   :  { %v446_v24 = vld [vmem:[#allocation3 + $0x2c] sm:$0xf0]  ;;  %v413_v25 = vor.u32 %v449_v20, %v410_v22  ;;  %v444_v26 = vld [vmem:[#allocation3 + $0x24] sm:$0xf]  ;;  %v386_v27 = vld [vmem:[#allocation3 + $0x30] sm:$0xf0] }
   0xc   :  { %v392_v28 = vld [vmem:[#allocation3 + $0x28] sm:$0xf]  ;;  %189 = vmatpush.bf16.msra.mxu0 %v401_v16  ;;  %v385_v29 = vor.u32 %v446_v24, %v384_v23  ;;  %v447_v30 = vld [vmem:[#allocation3 + $0x34] sm:$0xf0]  ;;  %v445_v31 = vld [vmem:[#allocation3 + $0x2c] sm:$0xf]  ;;  %v389_v33 = vor.u32 %v444_v26, %v386_v27 }
   0xd   :  { %v394_v32 = vld [vmem:[#allocation3 + $0x38] sm:$0xf0]  ;;  %208 = vmatpush.bf16.msra.mxu1 %v405_v17  ;;  %v393_v34 = vor.u32 %v447_v30, %v392_v28  ;;  %v368_v35 = vld [vmem:[#allocation3] sm:$0xf]  ;;  %v442_v36 = vld [vmem:[#allocation3 + $0xc] sm:$0xf0] }
   0xe   :  { %227 = vmatpush.bf16.msra.mxu2 %v409_v21  ;;  %v440_v37 = vld [vmem:[#allocation3 + $0x4] sm:$0xf]  ;;  %246 = vmatpush.bf16.msra.mxu3 %v413_v25  ;;  %v397_v38 = vor.u32 %v445_v31, %v394_v32  ;;  %v370_v39 = vld [vmem:[#allocation3 + $0x10] sm:$0xf0]  ;;  %v376_v40 = vld [vmem:[#allocation3 + $0x8] sm:$0xf]  ;;  %v369_v44 = vor.u32 %v442_v36, %v368_v35 }
   0xf   :  { %v443_v41 = vld [vmem:[#allocation3 + $0x14] sm:$0xf0]  ;;  %v441_v42 = vld [vmem:[#allocation3 + $0xc] sm:$0xf]  ;;  %v378_v43 = vld [vmem:[#allocation3 + $0x18] sm:$0xf0]  ;;  %v373_v45 = vor.u32 %v440_v37, %v370_v39 }
  0x10   :  { %190 = vmatpush.bf16.msra.mxu0 %v385_v29  ;;  %v377_v46 = vor.u32 %v443_v41, %v376_v40  ;;  %v381_v47 = vor.u32 %v441_v42, %v378_v43  ;;  %v438_v48 = vld [vmem:[%s544_s0] sm:$0xff]  ;;  %vm177_vm0 = vcmask 523264   ;;  %v439_v49 = vld [vmem:[%s544_s0 + $0x8] sm:$0xff] }
  0x11   :  { %209 = vmatpush.bf16.msra.mxu1 %v389_v33  ;;  %v311_v50 = vld [vmem:[%s546_s2] sm:$0xf] }
  0x12   :  { %228 = vmatpush.bf16.msra.mxu2 %v393_v34  ;;  %247 = vmatpush.bf16.msra.mxu3 %v397_v38  ;;  %v313_v51 = vperm.slane %v311_v50, 0  ;;  %v314_v52 = vperm.slane %v311_v50, 1  ;;  %v315_v58 = vperm.slane %v311_v50, 2  ;;  %v316_v59 = vperm.slane %v311_v50, 3 }
  0x14   :  { %191 = vmatpush.bf16.msra.mxu0 %v369_v44 }
  0x15   :  { %210 = vmatpush.bf16.msra.mxu1 %v373_v45 }
  0x16   :  { %229 = vmatpush.bf16.msra.mxu2 %v377_v46  ;;  %248 = vmatpush.bf16.msra.mxu3 %v381_v47 }
  0x17   :  { %430 = vmatmul.msk.bf16.vlgmr.msra.gmra.mxu0 %vm177_vm0, %v438_v48 }
  0x18   :  { %432 = vmatmul.msk.bf16.vlgmr.msra.gmra.mxu1 %vm177_vm0, %v438_v48 }
  0x19   :  { %434 = vmatmul.msk.bf16.vlgmr.msra.gmra.mxu2 %vm177_vm0, %v438_v48  ;;  %436 = vmatmul.msk.bf16.vlgmr.msra.gmra.mxu3 %vm177_vm0, %v438_v48 }
  0x27   :  { %431 = vmatmul.msk.bf16.gmra.mxu0 %vm177_vm0, %v439_v49 }
  0x28   :  { %433 = vmatmul.msk.bf16.gmra.mxu1 %vm177_vm0, %v439_v49 }
  0x29   :  { %435 = vmatmul.msk.bf16.gmra.mxu2 %vm177_vm0, %v439_v49  ;;  %437 = vmatmul.msk.bf16.gmra.mxu3 %vm177_vm0, %v439_v49 }
  0x94   :  { %v193_v53 = vpop.f32.mrf.mxu0 }
  0x95   :  { %v321_v54 = vadd.f32 %v313_v51, %v193_v53  ;;  %v212_v55 = vpop.f32.mrf.mxu1 }
  0x96   :  { %v322_v56 = vadd.f32 %v314_v52, %v212_v55 }
  0x98   :  { %v337_v57 = vpack.c.bf16 %v322_v56, %v321_v54 }
  0x9a   :  { %345 = vst [vmem:[%s547_s3] sm:$0xff] %v337_v57 }
  0x9c   :  { %v231_v60 = vpop.f32.mrf.mxu2  ;;  %v250_v62 = vpop.f32.mrf.mxu3 }
  0x9d   :  { %v323_v61 = vadd.f32 %v315_v58, %v231_v60  ;;  %v195_v63 = vpop.f32.mrf.mxu0  ;;  %v324_v0 = vadd.f32 %v316_v59, %v250_v62  ;;  %v214_v2 = vpop.f32.mrf.mxu1 }
  0x9e   :  { %v325_v1 = vadd.f32 %v313_v51, %v195_v63  ;;  %v326_v3 = vadd.f32 %v314_v52, %v214_v2 }
  0x9f   :  { %v338_v4 = vpack.c.bf16 %v324_v0, %v323_v61 }
  0xa0   :  { %v339_v5 = vpack.c.bf16 %v326_v3, %v325_v1 }
  0xa1   :  { %346 = vst [vmem:[%s547_s3 + $0x8] sm:$0xff] %v338_v4 }
  0xa2   :  { %347 = vst [vmem:[%s547_s3 + $0x10] sm:$0xff] %v339_v5 }
  0xa4   :  { %v233_v6 = vpop.f32.mrf.mxu2  ;;  %v252_v8 = vpop.f32.mrf.mxu3 }
  0xa5   :  { %v327_v7 = vadd.f32 %v315_v58, %v233_v6  ;;  %v198_v9 = vpop.f32.mrf.mxu0  ;;  %v328_v10 = vadd.f32 %v316_v59, %v252_v8  ;;  %v217_v12 = vpop.f32.mrf.mxu1 }
  0xa6   :  { %v329_v11 = vadd.f32 %v313_v51, %v198_v9  ;;  %v330_v13 = vadd.f32 %v314_v52, %v217_v12 }
  0xa7   :  { %v340_v14 = vpack.c.bf16 %v328_v10, %v327_v7 }
  0xa8   :  { %v341_v15 = vpack.c.bf16 %v330_v13, %v329_v11 }
  0xa9   :  { %348 = vst [vmem:[%s547_s3 + $0x18] sm:$0xff] %v340_v14 }
  0xaa   :  { %349 = vst [vmem:[%s547_s3 + $0x20] sm:$0xff] %v341_v15 }
  0xac   :  { %v236_v16 = vpop.f32.mrf.mxu2  ;;  %v255_v18 = vpop.f32.mrf.mxu3 }
  0xad   :  { %v331_v17 = vadd.f32 %v315_v58, %v236_v16  ;;  %v200_v19 = vpop.f32.mrf.mxu0  ;;  %v332_v20 = vadd.f32 %v316_v59, %v255_v18  ;;  %v219_v22 = vpop.f32.mrf.mxu1 }
  0xae   :  { %v333_v21 = vadd.f32 %v313_v51, %v200_v19  ;;  %v334_v23 = vadd.f32 %v314_v52, %v219_v22 }
  0xaf   :  { %v342_v24 = vpack.c.bf16 %v332_v20, %v331_v17 }
  0xb0   :  { %v343_v25 = vpack.c.bf16 %v334_v23, %v333_v21 }
  0xb1   :  { %350 = vst [vmem:[%s547_s3 + $0x28] sm:$0xff] %v342_v24 }
  0xb2   :  { %351 = vst [vmem:[%s547_s3 + $0x30] sm:$0xff] %v343_v25 }
  0xb4   :  { %v238_v26 = vpop.f32.mrf.mxu2  ;;  %v257_v28 = vpop.f32.mrf.mxu3 }
  0xb5   :  { %v335_v27 = vadd.f32 %v315_v58, %v238_v26  ;;  %v336_v29 = vadd.f32 %v316_v59, %v257_v28 }
  0xb7   :  { %v344_v30 = vpack.c.bf16 %v336_v29, %v335_v27 }
  0xb9   :  { %352 = vst [vmem:[%s547_s3 + $0x38] sm:$0xff] %v344_v30 }
  0xba   :  { %357 = vsyncpa [#allocation4], 1 }

// kernel: _lambda_.4
= control target key start
LH: loop header
LB: loop body
LE: loop exit
PB: predicated region body
PF: predicated region fallthrough
CT: control target
= control target key end

     0   :  { %8 = vsyncpa [#allocation4], 0  ;;  %s954_s0 = inlined_call_operand.vmem [shape: bf16[16,32], index: 0, kind: input, shape index: {}]   ;;  %s955_s1 = inlined_call_operand.hbm [shape: bf16[32,1024], index: 1, kind: input, shape index: {}]   ;;  %s956_s2 = inlined_call_operand.vmem [shape: f32[1,1024], index: 2, kind: input, shape index: {}]   ;;  %s957_s3 = inlined_call_operand.vmem [shape: bf16[16,1024], index: 3, kind: output, shape index: {}]  }
   0x1   :  { %10 = vsyncpa [#allocation4 + $0x1], 0  ;;  %s839_s12 = smov 0   ;;  %s841_s13 = smov 0  }
   0x2   :  { %s843_s14 = smov 0   ;;  %s845_s15 = smov 0  }
   0x3   :  { %s847_s16 = smov 0   ;;  %s849_s17 = smov 0  }
   0x4 LB: > { %s608_s18 = sadd.s32 4294967295, %s814_s17   ;;  %s31_s19 = sadd.s32 1, %s810_s16  ;;  %s814_s17 = sphi %s849_s17, %s16_s17   ;;  %s810_s16 = sphi %s847_s16, %s965_s16   ;;  %s806_s15 = sphi %s845_s15, %s964_s15   ;;  %s802_s14 = sphi %s843_s14, %s963_s14   ;;  %s798_s13 = sphi %s841_s13, %s962_s13   ;;  %s794_s12 = sphi %s839_s12, %s961_s12  }
   0x5   : > { %p33_p0 = scmp.ge.s32.totalorder %s31_s19, 2  ;;  %s72_s20 = sadd.s32 1, %s802_s14 }
   0x6   : > { %p79_p1 = scmp.ne.s32.totalorder %s802_s14, %s798_s13  ;;  %p80_p2 = scmp.eq.s32.totalorder %s814_s17, 0 }
   0x7   : > { %s967_s19 = smov (%p33_p0, %s31_s19), 0  ;;  %p85_p4 = scmp.ne.s32.totalorder %s798_s13, %s794_s12 }
   0x8   : > { %p875_p3 = por %p80_p2, %p79_p1  ;;  %s68_s22 = ssub.s32 %s810_s16, %s967_s19 }
   0x9   : > { %p86_p5 = scmp.eq.s32.totalorder %s608_s18, 0  ;;  %p70_p6 = scmp.eq.s32.totalorder %s68_s22, 0 }
   0xa   : > { %p137_p7 = scmp.eq.s32.totalorder %s608_s18, 1  ;;  %p682_p10 = scmp.lt.s32.totalorder %s814_s17, 2 }
   0xb   : > { %p882_p8 = por %p86_p5, %p85_p4  ;;  %s175_s26 = sand.u32 1, %s802_s14  }
   0xc   : > { %s887_s24 = scalar_select %p70_p6, %s802_s14, %s72_s20  }
   0xd   : > { %p889_p9 = por %p137_p7, %p79_p1  ;;  %s665_s27 = sshll.u32 %s810_s16, 4 }
   0xe   : > { %s613_s28 = sshll.u32 %s175_s26, 6  ;;  %s187_s4 = scalar_lea.hbm %s955_s1, %s665_s27 }
   0xf   : > { %s188_s5 = sshll.u32 %s187_s4, 4  ;;  %s179_s6 = scalar_lea.vmem [#allocation3], %s613_s28  ;;  %s189_s5 = int_to_ptr.hbm [resolvable:$true] %s188_s5 }
  0x10   : > { %s190_s7 = sshll.u32 %s179_s6, 4  ;;  %p679_p11 = pnand %p682_p10, %p875_p3  ;;  %s191_s7 = int_to_ptr.vmem [resolvable:$true] %s190_s7 }
  0x11   : > { %p616_p12 = scmp.ge.s32.totalorder %s814_s17, 1  ;;  %s176_s8 = scalar_lea.sflag [#allocation4], %s175_s26 }
  0x12   : > { %s816_s9 = smov 512   ;;  %s817_s10 = smov 256  }
  0x13   : > { %s818_s11 = smov 16   ;;  %p206_p13 = scmp.lt.s32.totalorder %s814_s17, 3 }
  0x14   : > { %681 = dma.hbm_to_vmem [thread:$0]  (!%p679_p11), %s189_s5, 1024, %s191_s7, %s176_s8, %s816_s9, %s817_s10, %s818_s11  }
  0x15   : > { %p207_p0 = pnand %p616_p12, %p206_p13 }
  0x16   : > { %s904_s12 = sand.u32 (!%p207_p0), 1, %s798_s13  }
  0x17   : > { %210 = sbr.rel (%p207_p0) target bundleno = 196 (0xc4), region = 32  ;;  %s617_s18 = sshll.u32 (!%p207_p0), %s904_s12, 6 }
  0x18   : > { %s213_s20 = scalar_lea.sflag (!%p207_p0), [#allocation4], %s904_s12  ;;  %s216_s22 = scalar_lea.vmem (!%p207_p0), [#allocation3], %s617_s18 }
  0x1c   : > { %789 = dma.done.wait (%p882_p8), %s213_s20, 1024  }
  0x1d   : > { %791 = vsyncadd (%p882_p8), %s213_s20, 4294966272  ;;  %v642_v0 = vld [vmem:[%s216_s22 + $0x20] sm:$0xf]  ;;  %v673_v1 = vld [vmem:[%s216_s22 + $0x2c] sm:$0xf0]  ;;  %vm345_vm0 = vcmask 261120  }
  0x1e   : > { %v671_v2 = vld [vmem:[%s216_s22 + $0x24] sm:$0xf]  ;;  %v643_v3 = vor.u32 %v673_v1, %v642_v0  ;;  %v644_v4 = vld [vmem:[%s216_s22 + $0x30] sm:$0xf0]  ;;  %v650_v5 = vld [vmem:[%s216_s22 + $0x28] sm:$0xf] }
  0x1f   : > { %v674_v6 = vld [vmem:[%s216_s22 + $0x34] sm:$0xf0]  ;;  %v647_v7 = vor.u32 %v671_v2, %v644_v4  ;;  %v672_v9 = vld [vmem:[%s216_s22 + $0x2c] sm:$0xf]  ;;  %v652_v10 = vld [vmem:[%s216_s22 + $0x38] sm:$0xf0] }
  0x20   : > { %v651_v8 = vor.u32 %v674_v6, %v650_v5  ;;  %v626_v11 = vld [vmem:[%s216_s22] sm:$0xf]  ;;  %355 = vmatpush.bf16.msra.mxu0 %v643_v3  ;;  %v655_v12 = vor.u32 %v672_v9, %v652_v10  ;;  %v669_v13 = vld [vmem:[%s216_s22 + $0xc] sm:$0xf0]  ;;  %v667_v14 = vld [vmem:[%s216_s22 + $0x4] sm:$0xf] }
  0x21   : > { %v628_v15 = vld [vmem:[%s216_s22 + $0x10] sm:$0xf0]  ;;  %369 = vmatpush.bf16.msra.mxu1 %v647_v7  ;;  %v627_v16 = vor.u32 %v669_v13, %v626_v11  ;;  %v634_v18 = vld [vmem:[%s216_s22 + $0x8] sm:$0xf]  ;;  %v670_v19 = vld [vmem:[%s216_s22 + $0x14] sm:$0xf0] }
  0x22   : > { %383 = vmatpush.bf16.msra.mxu2 %v651_v8  ;;  %v631_v17 = vor.u32 %v667_v14, %v628_v15  ;;  %v668_v20 = vld [vmem:[%s216_s22 + $0xc] sm:$0xf]  ;;  %397 = vmatpush.bf16.msra.mxu3 %v655_v12  ;;  %v635_v21 = vor.u32 %v670_v19, %v634_v18  ;;  %v636_v22 = vld [vmem:[%s216_s22 + $0x18] sm:$0xf0]  ;;  %v666_v24 = vld [vmem:[%s954_s0] sm:$0xff]  ;;  %s619_s26 = sshll.u32 %s806_s15, 2 }
  0x23   : > { %v639_v23 = vor.u32 %v668_v20, %v636_v22  ;;  %p263_p1 = scmp.lt.s32.totalorder %s619_s26, 7  ;;  %s618_s30 = sshll.u32 %s904_s12, 5 }
  0x24   : > { %356 = vmatpush.bf16.msra.mxu0 %v627_v16  ;;  %s920_s4 = scalar_lea.vmem [#allocation5], %s618_s30  ;;  %s675_s5 = sshll.u32 (%p889_p9), %s806_s15, 4 }
  0x25   : > { %370 = vmatpush.bf16.msra.mxu1 %v631_v17  ;;  %s969_s26 = smov (!%p263_p1, %s619_s26), 7  ;;  %s478_s8 = scalar_lea.vmem (%p889_p9), %s957_s3, %s675_s5 }
  0x26   : > { %384 = vmatpush.bf16.msra.mxu2 %v635_v21  ;;  %398 = vmatpush.bf16.msra.mxu3 %v639_v23  ;;  %s265_s29 = scalar_lea.vmem %s956_s2, %s969_s26 }
  0x27   : > { %656 = vmatmul.msk.bf16.vlgmr.msra.gmra.mxu0 %vm345_vm0, %v666_v24  ;;  %v432_v25 = vld [vmem:[%s265_s29] sm:$0xf] }
  0x28   : > { %657 = vmatmul.msk.bf16.vlgmr.msra.gmra.mxu1 %vm345_vm0, %v666_v24  ;;  %v434_v26 = vperm.slane %v432_v25, 0  ;;  %v435_v27 = vperm.slane %v432_v25, 1  ;;  %v436_v34 = vperm.slane %v432_v25, 2  ;;  %v437_v35 = vperm.slane %v432_v25, 3 }
  0x29   : > { %658 = vmatmul.msk.bf16.vlgmr.msra.gmra.mxu2 %vm345_vm0, %v666_v24  ;;  %659 = vmatmul.msk.bf16.vlgmr.msra.gmra.mxu3 %vm345_vm0, %v666_v24 }
  0xa4   : > { %v358_v28 = vpop.f32.mrf.mxu0 }
  0xa5   : > { %v442_v29 = vadd.f32 %v434_v26, %v358_v28  ;;  %v372_v30 = vpop.f32.mrf.mxu1 }
  0xa6   : > { %v443_v31 = vadd.f32 %v435_v27, %v372_v30 }
  0xa7   : > { %v450_v32 = vmax.f32 %v442_v29, 0.0 }
  0xa8   : > { %v451_v33 = vmax.f32 %v443_v31, 0.0 }
  0xaa   : > { %v458_v36 = vpack.c.bf16 %v451_v33, %v450_v32 }
  0xac   : > { %v386_v37 = vpop.f32.mrf.mxu2  ;;  %462 = vst [vmem:[%s920_s4] sm:$0xff] %v458_v36  ;;  %v400_v39 = vpop.f32.mrf.mxu3 }
  0xad   : > { %v444_v38 = vadd.f32 %v436_v34, %v386_v37  ;;  %v360_v40 = vpop.f32.mrf.mxu0  ;;  %v445_v41 = vadd.f32 %v437_v35, %v400_v39  ;;  %v374_v43 = vpop.f32.mrf.mxu1 }
  0xae   : > { %v446_v42 = vadd.f32 %v434_v26, %v360_v40  ;;  %v447_v45 = vadd.f32 %v435_v27, %v374_v43 }
  0xaf   : > { %v452_v44 = vmax.f32 %v444_v38, 0.0  ;;  %v453_v46 = vmax.f32 %v445_v41, 0.0 }
  0xb0   : > { %v454_v47 = vmax.f32 %v446_v42, 0.0  ;;  %v455_v48 = vmax.f32 %v447_v45, 0.0 }
  0xb1   : > { %v459_v49 = vpack.c.bf16 %v453_v46, %v452_v44 }
  0xb2   : > { %v460_v50 = vpack.c.bf16 %v455_v48, %v454_v47 }
  0xb3   : > { %463 = vst [vmem:[%s920_s4 + $0x8] sm:$0xff] %v459_v49  ;;  %v491_v58 = vld [vmem:[%s920_s4] sm:$0xff] (%p889_p9) }
  0xb4   : > { %v388_v51 = vpop.f32.mrf.mxu2  ;;  %464 = vst [vmem:[%s920_s4 + $0x10] sm:$0xff] %v460_v50  ;;  %v402_v53 = vpop.f32.mrf.mxu3 }
  0xb5   : > { %v448_v52 = vadd.f32 %v436_v34, %v388_v51  ;;  %v449_v54 = vadd.f32 %v437_v35, %v402_v53  ;;  %492 = vst [vmem:[%s478_s8] sm:$0xff] (%p889_p9), %v491_v58 }
  0xb7   : > { %v456_v55 = vmax.f32 %v448_v52, 0.0  ;;  %v457_v56 = vmax.f32 %v449_v54, 0.0  ;;  %472 = sbr.rel (!%p889_p9) target bundleno = 196 (0xc4), region = 48 }
  0xb9   : > { %v461_v57 = vpack.c.bf16 %v457_v56, %v456_v55 }
  0xba   : > { %v493_v59 = vld [vmem:[%s920_s4 + $0x8] sm:$0xff] (%p889_p9) }
  0xbb   : > { %465 = vst [vmem:[%s920_s4 + $0x18] sm:$0xff] %v461_v57  ;;  %v495_v60 = vld [vmem:[%s920_s4 + $0x10] sm:$0xff] (%p889_p9) }
  0xbc   : > { %494 = vst [vmem:[%s478_s8 + $0x8] sm:$0xff] %v493_v59 }
  0xbd   : > { %496 = vst [vmem:[%s478_s8 + $0x20] sm:$0xff] %v495_v60 }
  0xc2   : > { %v497_v61 = vld [vmem:[%s920_s4 + $0x18] sm:$0xff] }
  0xc3   : > { %498 = vst [vmem:[%s478_s8 + $0x28] sm:$0xff] %v497_v61 }
  0xc4 PF: > { %s16_s17 = sadd.s32 1, %s814_s17   ;;  %s961_s12 = smov %s798_s13 }
  0xc5   : > { %p13_p2 = scmp.ge.s32.totalorder %s16_s17, 4   ;;  %s962_s13 = smov %s802_s14 }
  0xc6   : > { %s963_s14 = smov %s887_s24  ;;  %s964_s15 = smov %s810_s16 }
  0xc7   : > { %s965_s16 = smov %s967_s19  ;;  %15 = sbr.rel (!%p13_p2) target bundleno = 4 (0x4), region = 109 }
  0xcc   :  { %514 = vsyncpa [#allocation4], 1 }
  0xcd   :  { %516 = vsyncpa [#allocation4 + $0x1], 1 }

// kernel: _lambda_.6
= control target key start
LH: loop header
LB: loop body
LE: loop exit
PB: predicated region body
PF: predicated region fallthrough
CT: control target
= control target key end

     0   :  { %vm163_vm0 = vcmask 261120   ;;  %s710_s1 = inlined_call_operand.vmem [shape: bf16[32,256], index: 1, kind: input, shape index: {}]   ;;  %s711_s0 = inlined_call_operand.vmem [shape: bf16[128,32], index: 0, kind: input, shape index: {}]   ;;  %s712_s2 = inlined_call_operand.vmem [shape: f32[1,256], index: 2, kind: input, shape index: {}]   ;;  %s713_s3 = inlined_call_operand.vmem [shape: bf16[128,256], index: 3, kind: output, shape index: {}]  }
   0x1   :  { %v501_v0 = vld [vmem:[%s710_s1 + $0x10] sm:$0xf]  ;;  %v534_v1 = vld [vmem:[%s710_s1 + $0x14] sm:$0xf0]  ;;  %v533_v2 = vld [vmem:[%s710_s1 + $0x14] sm:$0xf] }
   0x2   :  { %v502_v3 = vor.u32 %v534_v1, %v501_v0  ;;  %v503_v4 = vld [vmem:[%s710_s1 + $0x18] sm:$0xf0]  ;;  %v493_v5 = vld [vmem:[%s710_s1] sm:$0xf]  ;;  %v532_v6 = vld [vmem:[%s710_s1 + $0x4] sm:$0xf0] }
   0x3   :  { %v506_v7 = vor.u32 %v533_v2, %v503_v4  ;;  %v531_v8 = vld [vmem:[%s710_s1 + $0x4] sm:$0xf]  ;;  %v495_v9 = vld [vmem:[%s710_s1 + $0x8] sm:$0xf0]  ;;  %v494_v10 = vor.u32 %v532_v6, %v493_v5  ;;  %v525_v16 = vld [vmem:[%s711_s0 + $0x10] sm:$0xff] }
   0x4   :  { %194 = vmatpush.bf16.msra.mxu0 %v502_v3  ;;  %535 = vmatpush.bf16.msra.mxu2 %v502_v3  ;;  %v498_v11 = vor.u32 %v531_v8, %v495_v9  ;;  %v523_v12 = vld [vmem:[%s711_s0] sm:$0xff]  ;;  %v524_v14 = vld [vmem:[%s711_s0 + $0x8] sm:$0xff]  ;;  %v529_v17 = vld [vmem:[%s711_s0 + $0x30] sm:$0xff] }
   0x5   :  { %243 = vmatpush.bf16.msra.mxu1 %v506_v7  ;;  %537 = vmatpush.bf16.msra.mxu3 %v506_v7  ;;  %v527_v13 = vld [vmem:[%s711_s0 + $0x20] sm:$0xff]  ;;  %v528_v15 = vld [vmem:[%s711_s0 + $0x28] sm:$0xff]  ;;  %v526_v18 = vld [vmem:[%s711_s0 + $0x18] sm:$0xff] }
   0x6   :  { %v530_v19 = vld [vmem:[%s711_s0 + $0x38] sm:$0xff]  ;;  %v385_v20 = vld [vmem:[%s712_s2] sm:$0x3] }
   0x7   :  { %v626_v21 = vperm.slane %v385_v20, 0  ;;  %v628_v22 = vperm.slane %v385_v20, 1 }
   0x8   :  { %195 = vmatpush.bf16.msra.mxu0 %v494_v10  ;;  %536 = vmatpush.bf16.msra.mxu2 %v494_v10 }
   0x9   :  { %244 = vmatpush.bf16.msra.mxu1 %v498_v11  ;;  %538 = vmatpush.bf16.msra.mxu3 %v498_v11 }
   0xb   :  { %507 = vmatmul.msk.bf16.vlgmr.msra.gmra.mxu0 %vm163_vm0, %v523_v12  ;;  %511 = vmatmul.msk.bf16.vlgmr.msra.gmra.mxu2 %vm163_vm0, %v527_v13 }
   0xc   :  { %515 = vmatmul.msk.bf16.vlgmr.msra.gmra.mxu1 %vm163_vm0, %v523_v12  ;;  %519 = vmatmul.msk.bf16.vlgmr.msra.gmra.mxu3 %vm163_vm0, %v527_v13 }
  0x1b   :  { %508 = vmatmul.msk.bf16.gmra.mxu0 %vm163_vm0, %v524_v14  ;;  %512 = vmatmul.msk.bf16.gmra.mxu2 %vm163_vm0, %v528_v15 }
  0x1c   :  { %516 = vmatmul.msk.bf16.gmra.mxu1 %vm163_vm0, %v524_v14  ;;  %520 = vmatmul.msk.bf16.gmra.mxu3 %vm163_vm0, %v528_v15 }
  0x2b   :  { %509 = vmatmul.msk.bf16.gmra.mxu0 %vm163_vm0, %v525_v16  ;;  %513 = vmatmul.msk.bf16.gmra.mxu2 %vm163_vm0, %v529_v17 }
  0x2c   :  { %517 = vmatmul.msk.bf16.gmra.mxu1 %vm163_vm0, %v525_v16  ;;  %521 = vmatmul.msk.bf16.gmra.mxu3 %vm163_vm0, %v529_v17 }
  0x3b   :  { %510 = vmatmul.msk.bf16.gmra.mxu0 %vm163_vm0, %v526_v18  ;;  %514 = vmatmul.msk.bf16.gmra.mxu2 %vm163_vm0, %v530_v19 }
  0x3c   :  { %518 = vmatmul.msk.bf16.gmra.mxu1 %vm163_vm0, %v526_v18  ;;  %522 = vmatmul.msk.bf16.gmra.mxu3 %vm163_vm0, %v530_v19 }
  0x88   :  { %v197_v23 = vpop.f32.mrf.mxu0 }
  0x89   :  { %v391_v24 = vadd.f32 %v626_v21, %v197_v23  ;;  %v246_v25 = vpop.f32.mrf.mxu1 }
  0x8a   :  { %v392_v26 = vadd.f32 %v628_v22, %v246_v25 }
  0x8c   :  { %v423_v27 = vpack.c.bf16 %v392_v26, %v391_v24 }
  0x8e   :  { %439 = vst [vmem:[%s713_s3] sm:$0xff] %v423_v27  ;;  %v217_v28 = vpop.f32.mrf.mxu2 }
  0x8f   :  { %v407_v29 = vadd.f32 %v626_v21, %v217_v28  ;;  %v266_v30 = vpop.f32.mrf.mxu3 }
  0x90   :  { %v408_v31 = vadd.f32 %v628_v22, %v266_v30  ;;  %v199_v32 = vpop.f32.mrf.mxu0 }
  0x91   :  { %v393_v33 = vadd.f32 %v626_v21, %v199_v32  ;;  %v248_v34 = vpop.f32.mrf.mxu1 }
  0x92   :  { %v431_v35 = vpack.c.bf16 %v408_v31, %v407_v29  ;;  %v394_v36 = vadd.f32 %v628_v22, %v248_v34 }
  0x94   :  { %447 = vst [vmem:[%s713_s3 + $0x40] sm:$0xff] %v431_v35  ;;  %v424_v37 = vpack.c.bf16 %v394_v36, %v393_v33 }
  0x96   :  { %440 = vst [vmem:[%s713_s3 + $0x8] sm:$0xff] %v424_v37  ;;  %v219_v38 = vpop.f32.mrf.mxu2 }
  0x97   :  { %v409_v39 = vadd.f32 %v626_v21, %v219_v38  ;;  %v268_v40 = vpop.f32.mrf.mxu3 }
  0x98   :  { %v410_v41 = vadd.f32 %v628_v22, %v268_v40  ;;  %v202_v42 = vpop.f32.mrf.mxu0 }
  0x99   :  { %v395_v43 = vadd.f32 %v626_v21, %v202_v42  ;;  %v251_v44 = vpop.f32.mrf.mxu1 }
  0x9a   :  { %v432_v45 = vpack.c.bf16 %v410_v41, %v409_v39  ;;  %v396_v46 = vadd.f32 %v628_v22, %v251_v44 }
  0x9c   :  { %448 = vst [vmem:[%s713_s3 + $0x48] sm:$0xff] %v432_v45  ;;  %v425_v47 = vpack.c.bf16 %v396_v46, %v395_v43 }
  0x9e   :  { %441 = vst [vmem:[%s713_s3 + $0x10] sm:$0xff] %v425_v47  ;;  %v222_v48 = vpop.f32.mrf.mxu2 }
  0x9f   :  { %v411_v49 = vadd.f32 %v626_v21, %v222_v48  ;;  %v271_v50 = vpop.f32.mrf.mxu3 }
  0xa0   :  { %v412_v51 = vadd.f32 %v628_v22, %v271_v50  ;;  %v204_v52 = vpop.f32.mrf.mxu0 }
  0xa1   :  { %v397_v53 = vadd.f32 %v626_v21, %v204_v52  ;;  %v253_v54 = vpop.f32.mrf.mxu1 }
  0xa2   :  { %v433_v55 = vpack.c.bf16 %v412_v51, %v411_v49  ;;  %v398_v56 = vadd.f32 %v628_v22, %v253_v54 }
  0xa4   :  { %449 = vst [vmem:[%s713_s3 + $0x50] sm:$0xff] %v433_v55  ;;  %v426_v57 = vpack.c.bf16 %v398_v56, %v397_v53 }
  0xa6   :  { %442 = vst [vmem:[%s713_s3 + $0x18] sm:$0xff] %v426_v57  ;;  %v224_v58 = vpop.f32.mrf.mxu2 }
  0xa7   :  { %v413_v59 = vadd.f32 %v626_v21, %v224_v58  ;;  %v273_v60 = vpop.f32.mrf.mxu3 }
  0xa8   :  { %v414_v61 = vadd.f32 %v628_v22, %v273_v60  ;;  %v207_v62 = vpop.f32.mrf.mxu0 }
  0xa9   :  { %v399_v63 = vadd.f32 %v626_v21, %v207_v62  ;;  %v256_v0 = vpop.f32.mrf.mxu1 }
  0xaa   :  { %v434_v1 = vpack.c.bf16 %v414_v61, %v413_v59  ;;  %v400_v2 = vadd.f32 %v628_v22, %v256_v0 }
  0xac   :  { %450 = vst [vmem:[%s713_s3 + $0x58] sm:$0xff] %v434_v1  ;;  %v427_v3 = vpack.c.bf16 %v400_v2, %v399_v63 }
  0xae   :  { %443 = vst [vmem:[%s713_s3 + $0x20] sm:$0xff] %v427_v3  ;;  %v227_v4 = vpop.f32.mrf.mxu2 }
  0xaf   :  { %v415_v5 = vadd.f32 %v626_v21, %v227_v4  ;;  %v276_v6 = vpop.f32.mrf.mxu3 }
  0xb0   :  { %v416_v7 = vadd.f32 %v628_v22, %v276_v6  ;;  %v209_v8 = vpop.f32.mrf.mxu0 }
  0xb1   :  { %v401_v9 = vadd.f32 %v626_v21, %v209_v8  ;;  %v258_v10 = vpop.f32.mrf.mxu1 }
  0xb2   :  { %v435_v11 = vpack.c.bf16 %v416_v7, %v415_v5  ;;  %v402_v12 = vadd.f32 %v628_v22, %v258_v10 }
  0xb4   :  { %451 = vst [vmem:[%s713_s3 + $0x60] sm:$0xff] %v435_v11  ;;  %v428_v13 = vpack.c.bf16 %v402_v12, %v401_v9 }
  0xb6   :  { %444 = vst [vmem:[%s713_s3 + $0x28] sm:$0xff] %v428_v13  ;;  %v229_v14 = vpop.f32.mrf.mxu2 }
  0xb7   :  { %v417_v15 = vadd.f32 %v626_v21, %v229_v14  ;;  %v278_v16 = vpop.f32.mrf.mxu3 }
  0xb8   :  { %v418_v17 = vadd.f32 %v628_v22, %v278_v16  ;;  %v212_v18 = vpop.f32.mrf.mxu0 }
  0xb9   :  { %v403_v19 = vadd.f32 %v626_v21, %v212_v18  ;;  %v261_v20 = vpop.f32.mrf.mxu1 }
  0xba   :  { %v436_v23 = vpack.c.bf16 %v418_v17, %v417_v15  ;;  %v404_v24 = vadd.f32 %v628_v22, %v261_v20 }
  0xbc   :  { %452 = vst [vmem:[%s713_s3 + $0x68] sm:$0xff] %v436_v23  ;;  %v429_v25 = vpack.c.bf16 %v404_v24, %v403_v19 }
  0xbe   :  { %445 = vst [vmem:[%s713_s3 + $0x30] sm:$0xff] %v429_v25  ;;  %v232_v26 = vpop.f32.mrf.mxu2 }
  0xbf   :  { %v419_v27 = vadd.f32 %v626_v21, %v232_v26  ;;  %v281_v28 = vpop.f32.mrf.mxu3 }
  0xc0   :  { %v420_v29 = vadd.f32 %v628_v22, %v281_v28  ;;  %v214_v30 = vpop.f32.mrf.mxu0 }
  0xc1   :  { %v405_v31 = vadd.f32 %v626_v21, %v214_v30  ;;  %v263_v32 = vpop.f32.mrf.mxu1 }
  0xc2   :  { %v437_v33 = vpack.c.bf16 %v420_v29, %v419_v27  ;;  %v406_v34 = vadd.f32 %v628_v22, %v263_v32 }
  0xc4   :  { %453 = vst [vmem:[%s713_s3 + $0x70] sm:$0xff] %v437_v33  ;;  %v430_v35 = vpack.c.bf16 %v406_v34, %v405_v31 }
  0xc6   :  { %446 = vst [vmem:[%s713_s3 + $0x38] sm:$0xff] %v430_v35  ;;  %v234_v36 = vpop.f32.mrf.mxu2 }
  0xc7   :  { %v421_v37 = vadd.f32 %v626_v21, %v234_v36  ;;  %v283_v38 = vpop.f32.mrf.mxu3 }
  0xc8   :  { %v422_v39 = vadd.f32 %v628_v22, %v283_v38 }
  0xca   :  { %v438_v40 = vpack.c.bf16 %v422_v39, %v421_v37 }
  0xcc   :  { %454 = vst [vmem:[%s713_s3 + $0x78] sm:$0xff] %v438_v40 }

// kernel: _lambda_.7
= control target key start
LH: loop header
LB: loop body
LE: loop exit
PB: predicated region body
PF: predicated region fallthrough
CT: control target
= control target key end

     0   :  { %s2175_s12 = smov 0   ;;  %s2177_s13 = smov 0   ;;  %s2799_s0 = inlined_call_operand.vmem [shape: bf16[512,144], index: 0, kind: input, shape index: {}]   ;;  %s2800_s1 = inlined_call_operand.vmem [shape: bf16[144,128], index: 1, kind: input, shape index: {}]   ;;  %s2801_s2 = inlined_call_operand.vmem [shape: f32[1,128], index: 2, kind: input, shape index: {}]   ;;  %s2802_s3 = inlined_call_operand.vmem [shape: f32[512,128], index: 3, kind: output, shape index: {}]  }
   0x1   :  { %s2179_s14 = smov 0  }
   0x2 LB: > { %s32_s15 = sadd.s32 1, %s2149_s13  ;;  %p1706_p0 = scmp.ge.s32.totalorder %s2153_s14, 1  ;;  %s2153_s14 = sphi %s2179_s14, %s13_s14   ;;  %s2149_s13 = sphi %s2177_s13, %s2840_s13   ;;  %s2145_s12 = sphi %s2175_s12, %s2839_s12  }
   0x3   : > { %p34_p1 = scmp.ge.s32.totalorder %s32_s15, 2  ;;  %p191_p2 = scmp.lt.s32.totalorder %s2153_s14, 3 }
   0x5   : > { %s2842_s15 = smov (%p34_p1, %s32_s15), 0  ;;  %p192_p3 = pnand %p1706_p0, %p191_p2 }
   0x6   : > { %s1707_s20 = sshll.u32 (!%p192_p3), %s2145_s12, 5 }
   0x7   : > { %195 = sbr.rel (%p192_p3) target bundleno = 350 (0x15e), region = 32  ;;  %p236_p4 = scmp.lt.s32.totalorder (!%p192_p3), %s1707_s20, 63 }
   0xc   : > { %v1966_v0 = vld [vmem:[%s2800_s1 + $0x38] sm:$0xff]  ;;  %v1967_v1 = vld [vmem:[%s2800_s1 + $0x40] sm:$0xff]  ;;  %v1965_v2 = vld [vmem:[%s2800_s1 + $0x30] sm:$0xff]  ;;  %s2844_s20 = smov (!%p236_p4, %s1707_s20), 63  ;;  %vm584_vm0 = vcmask 130048  }
   0xd   : > { %633 = vmatpush.bf16.msra.mxu0 %v1966_v0  ;;  %1968 = vmatpush.bf16.msra.mxu2 %v1966_v0  ;;  %s1926_s23 = sshll.u32 %s2844_s20, 3  ;;  %v1964_v3 = vld [vmem:[%s2800_s1 + $0x28] sm:$0xff]  ;;  %v1963_v7 = vld [vmem:[%s2800_s1 + $0x20] sm:$0xff]  ;;  %v1962_v11 = vld [vmem:[%s2800_s1 + $0x18] sm:$0xff] }
   0xe   : > { %729 = vmatpush.bf16.msra.mxu1 %v1967_v1  ;;  %1976 = vmatpush.bf16.msra.mxu3 %v1967_v1  ;;  %s2210_s26 = scalar_lea.vmem %s2799_s0, %s1926_s23  ;;  %v1961_v12 = vld [vmem:[%s2800_s1 + $0x10] sm:$0xff]  ;;  %v1960_v16 = vld [vmem:[%s2800_s1 + $0x8] sm:$0xff]  ;;  %v1959_v20 = vld [vmem:[%s2800_s1] sm:$0xff]  ;;  %s2333_s19 = scalar_lea.vmem %s2802_s3, %s1926_s23 }
   0xf   : > { %v1927_v4 = vld [vmem:[%s2210_s26 + $0x4] sm:$0xf]  ;;  %v1716_v5 = vld [vmem:[%s2210_s26 + $0x8] sm:$0xf0]  ;;  %v1945_v8 = vld [vmem:[%s2210_s26 + $0x94] sm:$0xf] }
  0x10   : > { %v1719_v6 = vor.u32 %v1927_v4, %v1716_v5  ;;  %v1788_v9 = vld [vmem:[%s2210_s26 + $0x98] sm:$0xf0]  ;;  %v1929_v13 = vld [vmem:[%s2210_s26 + $0x14] sm:$0xf]  ;;  %v1947_v17 = vld [vmem:[%s2210_s26 + $0xa4] sm:$0xf] }
  0x11   : > { %634 = vmatpush.bf16.msra.mxu0 %v1965_v2  ;;  %1969 = vmatpush.bf16.msra.mxu2 %v1965_v2  ;;  %v1791_v10 = vor.u32 %v1945_v8, %v1788_v9  ;;  %v1724_v14 = vld [vmem:[%s2210_s26 + $0x18] sm:$0xf0]  ;;  %v1796_v18 = vld [vmem:[%s2210_s26 + $0xa8] sm:$0xf0]  ;;  %v1714_v21 = vld [vmem:[%s2210_s26] sm:$0xf] }
  0x12   : > { %1876 = vmatmul.msk.bf16.vlgmr.msra.gmra.mxu1 %vm584_vm0, %v1719_v6  ;;  %v1727_v15 = vor.u32 %v1929_v13, %v1724_v14  ;;  %v1799_v19 = vor.u32 %v1947_v17, %v1796_v18  ;;  %v1928_v22 = vld [vmem:[%s2210_s26 + $0x4] sm:$0xf0]  ;;  %v1778_v23 = vld [vmem:[%s2210_s26 + $0x80] sm:$0xf]  ;;  %v1931_v27 = vld [vmem:[%s2210_s26 + $0x24] sm:$0xf] }
  0x13   : > { %1885 = vmatmul.msk.bf16.vlgmr.msra.gmra.mxu3 %vm584_vm0, %v1791_v10  ;;  %v1944_v24 = vld [vmem:[%s2210_s26 + $0x84] sm:$0xf0]  ;;  %v1715_v25 = vor.u32 %v1928_v22, %v1714_v21  ;;  %v1732_v28 = vld [vmem:[%s2210_s26 + $0x28] sm:$0xf0]  ;;  %v1949_v30 = vld [vmem:[%s2210_s26 + $0xb4] sm:$0xf] }
  0x14   : > { %v1779_v26 = vor.u32 %v1944_v24, %v1778_v23  ;;  %v1735_v29 = vor.u32 %v1931_v27, %v1732_v28  ;;  %v1804_v31 = vld [vmem:[%s2210_s26 + $0xb8] sm:$0xf0]  ;;  %v1722_v33 = vld [vmem:[%s2210_s26 + $0x10] sm:$0xf]  ;;  %v1930_v34 = vld [vmem:[%s2210_s26 + $0x14] sm:$0xf0] }
  0x15   : > { %635 = vmatpush.bf16.msra.mxu0 %v1964_v3  ;;  %1970 = vmatpush.bf16.msra.mxu2 %v1964_v3  ;;  %v1807_v32 = vor.u32 %v1949_v30, %v1804_v31  ;;  %v1786_v35 = vld [vmem:[%s2210_s26 + $0x90] sm:$0xf]  ;;  %v1946_v36 = vld [vmem:[%s2210_s26 + $0x94] sm:$0xf0]  ;;  %v1723_v37 = vor.u32 %v1930_v34, %v1722_v33  ;;  %v1933_v39 = vld [vmem:[%s2210_s26 + $0x34] sm:$0xf] }
  0x16   : > { %v1787_v38 = vor.u32 %v1946_v36, %v1786_v35  ;;  %v1740_v40 = vld [vmem:[%s2210_s26 + $0x38] sm:$0xf0]  ;;  %v1951_v42 = vld [vmem:[%s2210_s26 + $0xc4] sm:$0xf]  ;;  %v1812_v43 = vld [vmem:[%s2210_s26 + $0xc8] sm:$0xf0] }
  0x17   : > { %v1743_v41 = vor.u32 %v1933_v39, %v1740_v40  ;;  %v1815_v44 = vor.u32 %v1951_v42, %v1812_v43  ;;  %v1730_v45 = vld [vmem:[%s2210_s26 + $0x20] sm:$0xf]  ;;  %v1932_v46 = vld [vmem:[%s2210_s26 + $0x24] sm:$0xf0]  ;;  %v1935_v51 = vld [vmem:[%s2210_s26 + $0x44] sm:$0xf] }
  0x18   : > { %v1794_v47 = vld [vmem:[%s2210_s26 + $0xa0] sm:$0xf]  ;;  %v1948_v48 = vld [vmem:[%s2210_s26 + $0xa4] sm:$0xf0]  ;;  %v1731_v49 = vor.u32 %v1932_v46, %v1730_v45  ;;  %v1748_v52 = vld [vmem:[%s2210_s26 + $0x48] sm:$0xf0] }
  0x19   : > { %636 = vmatpush.bf16.msra.mxu0 %v1963_v7  ;;  %1971 = vmatpush.bf16.msra.mxu2 %v1963_v7  ;;  %v1795_v50 = vor.u32 %v1948_v48, %v1794_v47  ;;  %v1751_v53 = vor.u32 %v1935_v51, %v1748_v52  ;;  %v1953_v54 = vld [vmem:[%s2210_s26 + $0xd4] sm:$0xf]  ;;  %v1820_v55 = vld [vmem:[%s2210_s26 + $0xd8] sm:$0xf0]  ;;  %v1738_v57 = vld [vmem:[%s2210_s26 + $0x30] sm:$0xf] }
  0x1a   : > { %v1823_v56 = vor.u32 %v1953_v54, %v1820_v55  ;;  %v1934_v58 = vld [vmem:[%s2210_s26 + $0x34] sm:$0xf0]  ;;  %v1802_v59 = vld [vmem:[%s2210_s26 + $0xb0] sm:$0xf]  ;;  %v1937_v63 = vld [vmem:[%s2210_s26 + $0x54] sm:$0xf] }
  0x1b   : > { %v1950_v60 = vld [vmem:[%s2210_s26 + $0xb4] sm:$0xf0]  ;;  %v1739_v61 = vor.u32 %v1934_v58, %v1738_v57  ;;  %v1756_v0 = vld [vmem:[%s2210_s26 + $0x58] sm:$0xf0]  ;;  %v1955_v2 = vld [vmem:[%s2210_s26 + $0xe4] sm:$0xf] }
  0x1c   : > { %v1803_v62 = vor.u32 %v1950_v60, %v1802_v59  ;;  %v1759_v1 = vor.u32 %v1937_v63, %v1756_v0  ;;  %v1828_v3 = vld [vmem:[%s2210_s26 + $0xe8] sm:$0xf0]  ;;  %v1746_v5 = vld [vmem:[%s2210_s26 + $0x40] sm:$0xf]  ;;  %v1936_v6 = vld [vmem:[%s2210_s26 + $0x44] sm:$0xf0] }
  0x1d   : > { %637 = vmatpush.bf16.msra.mxu0 %v1962_v11  ;;  %1972 = vmatpush.bf16.msra.mxu2 %v1962_v11  ;;  %v1831_v4 = vor.u32 %v1955_v2, %v1828_v3  ;;  %v1810_v7 = vld [vmem:[%s2210_s26 + $0xc0] sm:$0xf]  ;;  %v1952_v8 = vld [vmem:[%s2210_s26 + $0xc4] sm:$0xf0]  ;;  %v1747_v9 = vor.u32 %v1936_v6, %v1746_v5  ;;  %v1939_v11 = vld [vmem:[%s2210_s26 + $0x64] sm:$0xf] }
  0x1e   : > { %v1811_v10 = vor.u32 %v1952_v8, %v1810_v7  ;;  %v1957_v14 = vld [vmem:[%s2210_s26 + $0xf4] sm:$0xf]  ;;  %v1754_v17 = vld [vmem:[%s2210_s26 + $0x50] sm:$0xf]  ;;  %v1938_v18 = vld [vmem:[%s2210_s26 + $0x54] sm:$0xf0] }
  0x1f   : > { %v1755_v21 = vor.u32 %v1938_v18, %v1754_v17  ;;  %v1941_v23 = vld [vmem:[%s2210_s26 + $0x74] sm:$0xf]  ;;  %v1772_v24 = vld [vmem:[%s2210_s26 + $0x78] sm:$0xf0]  ;;  %v1940_v27 = vld [vmem:[%s2210_s26 + $0x64] sm:$0xf0] }
  0x20   : > { %v1826_v28 = vld [vmem:[%s2210_s26 + $0xe0] sm:$0xf]  ;;  %v1780_v33 = vld [vmem:[%s2210_s26 + $0x88] sm:$0xf0]  ;;  %v1770_v36 = vld [vmem:[%s2210_s26 + $0x70] sm:$0xf] }
  0x21   : > { %638 = vmatpush.bf16.msra.mxu0 %v1961_v12  ;;  %1973 = vmatpush.bf16.msra.mxu2 %v1961_v12  ;;  %v1764_v12 = vld [vmem:[%s2210_s26 + $0x68] sm:$0xf0]  ;;  %v1958_v39 = vld [vmem:[%s2210_s26 + $0xf4] sm:$0xf0] }
  0x22   : > { %1877 = vmatmul.msk.bf16.gmra.mxu1 %vm584_vm0, %v1727_v15  ;;  %v1767_v13 = vor.u32 %v1939_v11, %v1764_v12  ;;  %v1836_v15 = vld [vmem:[%s2210_s26 + $0xf8] sm:$0xf0] }
  0x23   : > { %1886 = vmatmul.msk.bf16.gmra.mxu3 %vm584_vm0, %v1799_v19  ;;  %v1818_v19 = vld [vmem:[%s2210_s26 + $0xd0] sm:$0xf] }
  0x25   : > { %639 = vmatpush.bf16.msra.mxu0 %v1960_v16  ;;  %1974 = vmatpush.bf16.msra.mxu2 %v1960_v16  ;;  %v1839_v16 = vor.u32 %v1957_v14, %v1836_v15 }
  0x29   : > { %640 = vmatpush.bf16.msra.mxu0 %v1959_v20  ;;  %1975 = vmatpush.bf16.msra.mxu2 %v1959_v20  ;;  %v1954_v20 = vld [vmem:[%s2210_s26 + $0xd4] sm:$0xf0] }
  0x2a   : > { %v1819_v22 = vor.u32 %v1954_v20, %v1818_v19 }
  0x2c   : > { %641 = vmatmul.bf16.vlgmr.msra.gmra.mxu0 %v1715_v25  ;;  %681 = vmatmul.bf16.vlgmr.msra.gmra.mxu2 %v1779_v26  ;;  %v1775_v25 = vor.u32 %v1941_v23, %v1772_v24  ;;  %v1762_v26 = vld [vmem:[%s2210_s26 + $0x60] sm:$0xf] }
  0x2d   : > { %v1763_v30 = vor.u32 %v1940_v27, %v1762_v26 }
  0x32   : > { %1878 = vmatmul.msk.bf16.gmra.mxu1 %vm584_vm0, %v1735_v29  ;;  %v1956_v29 = vld [vmem:[%s2210_s26 + $0xe4] sm:$0xf0] }
  0x33   : > { %1887 = vmatmul.msk.bf16.gmra.mxu3 %vm584_vm0, %v1807_v32  ;;  %v1827_v31 = vor.u32 %v1956_v29, %v1826_v28  ;;  %v1943_v32 = vld [vmem:[%s2210_s26 + $0x84] sm:$0xf] }
  0x34   : > { %v1783_v34 = vor.u32 %v1943_v32, %v1780_v33 }
  0x3c   : > { %646 = vmatmul.bf16.gmra.mxu0 %v1723_v37  ;;  %686 = vmatmul.bf16.gmra.mxu2 %v1787_v38  ;;  %v1942_v37 = vld [vmem:[%s2210_s26 + $0x74] sm:$0xf0]  ;;  %v1834_v38 = vld [vmem:[%s2210_s26 + $0xf0] sm:$0xf] }
  0x3d   : > { %v1771_v40 = vor.u32 %v1942_v37, %v1770_v36 }
  0x42   : > { %1879 = vmatmul.msk.bf16.gmra.mxu1 %vm584_vm0, %v1743_v41  ;;  %v1835_v41 = vor.u32 %v1958_v39, %v1834_v38 }
  0x43   : > { %1888 = vmatmul.msk.bf16.gmra.mxu3 %vm584_vm0, %v1815_v44  ;;  %v2313_v44 = vld [vmem:[%s2801_s2] ss:$0 sm:$0xff] }
  0x4c   : > { %651 = vmatmul.bf16.gmra.mxu0 %v1731_v49  ;;  %691 = vmatmul.bf16.gmra.mxu2 %v1795_v50 }
  0x52   : > { %1880 = vmatmul.msk.bf16.gmra.mxu1 %vm584_vm0, %v1751_v53 }
  0x53   : > { %1889 = vmatmul.msk.bf16.gmra.mxu3 %vm584_vm0, %v1823_v56 }
  0x5c   : > { %656 = vmatmul.bf16.gmra.mxu0 %v1739_v61  ;;  %696 = vmatmul.bf16.gmra.mxu2 %v1803_v62 }
  0x62   : > { %1881 = vmatmul.msk.bf16.gmra.mxu1 %vm584_vm0, %v1759_v1 }
  0x63   : > { %1890 = vmatmul.msk.bf16.gmra.mxu3 %vm584_vm0, %v1831_v4 }
  0x6c   : > { %661 = vmatmul.bf16.gmra.mxu0 %v1747_v9  ;;  %701 = vmatmul.bf16.gmra.mxu2 %v1811_v10 }
  0x72   : > { %1882 = vmatmul.msk.bf16.gmra.mxu1 %vm584_vm0, %v1767_v13 }
  0x73   : > { %1891 = vmatmul.msk.bf16.gmra.mxu3 %vm584_vm0, %v1839_v16 }
  0x7c   : > { %666 = vmatmul.bf16.gmra.mxu0 %v1755_v21  ;;  %706 = vmatmul.bf16.gmra.mxu2 %v1819_v22 }
  0x82   : > { %1883 = vmatmul.msk.bf16.gmra.mxu1 %vm584_vm0, %v1775_v25 }
  0x8c   : > { %671 = vmatmul.bf16.gmra.mxu0 %v1763_v30  ;;  %711 = vmatmul.bf16.gmra.mxu2 %v1827_v31 }
  0x8f   : > { %v731_v35 = vpop.f32.mrf.mxu1 }
  0x92   : > { %1884 = vmatmul.msk.bf16.gmra.mxu1 %vm584_vm0, %v1783_v34 }
  0x96   : > { %v776_v50 = vpop.f32.mrf.mxu3 }
  0x97   : > { %v733_v42 = vpop.f32.mrf.mxu1 }
  0x9c   : > { %676 = vmatmul.bf16.gmra.mxu0 %v1771_v40  ;;  %716 = vmatmul.bf16.gmra.mxu2 %v1835_v41 }
  0x9e   : > { %v778_v61 = vpop.f32.mrf.mxu3 }
  0x9f   : > { %v736_v43 = vpop.f32.mrf.mxu1 }
  0xa6   : > { %v781_v14 = vpop.f32.mrf.mxu3 }
  0xa7   : > { %v738_v47 = vpop.f32.mrf.mxu1 }
  0xa9   : > { %v642_v45 = vpop.f32.mrf.mxu0 }
  0xaa   : > { %v732_v46 = vadd.f32 %v731_v35, %v642_v45 }
  0xac   : > { %v914_v48 = vadd.f32 %v2313_v44, %v732_v46 }
  0xae   : > { %v1892_v49 = vmul.f32 -1.442695, %v914_v48  ;;  %v2340_v39 = vpop.f32.mrf.mxu3 }
  0xaf   : > { %v2316_v51 = vpop.f32.mrf.mxu2  ;;  %v741_v54 = vpop.f32.mrf.mxu1 }
  0xb0   : > { %2002 = vpow2.f32 %v1892_v49 }
  0xb1   : > { %v644_v52 = vpop.f32.mrf.mxu0 }
  0xb2   : > { %v734_v53 = vadd.f32 %v733_v42, %v644_v52 }
  0xb4   : > { %v915_v55 = vadd.f32 %v2313_v44, %v734_v53 }
  0xb6   : > { %v2003_v56 = vpop.eup %2002  ;;  %v1893_v57 = vmul.f32 -1.442695, %v915_v55 }
  0xb7   : > { %v1042_v58 = vadd.f32 1.0, %v2003_v56  ;;  %v2319_v59 = vpop.f32.mrf.mxu2  ;;  %v2321_v63 = vpop.f32.mrf.mxu1 }
  0xb8   : > { %2004 = vpow2.f32 %v1893_v57 }
  0xb9   : > { %2006 = vrcp.f32 %v1042_v58  ;;  %v647_v60 = vpop.f32.mrf.mxu0  ;;  %v1083_v12 = vand.u32 2147483647, %v1042_v58  ;;  %v1085_v13 = vand.u32 2147483648, %v1042_v58  ;;  %vm1079_vm2 = vweird.f32 %v1042_v58 }
  0xba   : > { %v737_v62 = vadd.f32 %v736_v43, %v647_v60 }
  0xbb   : > { %v1086_v23 = vor.u32 1.1754944e-38, %v1085_v13  ;;  %vm1084_vm4 = vcmp.eq.f32.partialorder %v1083_v12, 8.507059e+37 }
  0xbc   : > { %v916_v0 = vadd.f32 %v2313_v44, %v737_v62 }
  0xbe   : > { %v2005_v1 = vpop.eup %2004  ;;  %v1894_v2 = vmul.f32 -1.442695, %v916_v0 }
  0xbf   : > { %v2007_v3 = vpop.eup %2006  ;;  %v1043_v4 = vadd.f32 1.0, %v2005_v1  ;;  %v687_v6 = vpop.f32.mrf.mxu2 }
  0xc0   : > { %v1075_v5 = vmul.f32 %v2007_v3, %v1042_v58  ;;  %2008 = vpow2.f32 %v1894_v2  ;;  %v777_v9 = vadd.f32 %v776_v50, %v687_v6  ;;  %v2324_v11 = vpop.f32.mrf.mxu1  ;;  %vm1080_vm1 = vweird.f32 %v2007_v3 }
  0xc1   : > { %2010 = vrcp.f32 %v1043_v4  ;;  %v649_v7 = vpop.f32.mrf.mxu0  ;;  %vm1081_vm3 = vmor %vm1079_vm2, %vm1080_vm1  ;;  %v1100_v33 = vand.u32 2147483648, %v1043_v4  ;;  %v1098_v36 = vand.u32 2147483647, %v1043_v4  ;;  %vm1094_vm6 = vweird.f32 %v1043_v4 }
  0xc2   : > { %v1076_v8 = vsub.f32 1.0, %v1075_v5  ;;  %v739_v10 = vadd.f32 %v738_v47, %v649_v7  ;;  %v932_v16 = vadd.f32 %v2313_v44, %v777_v9 }
  0xc3   : > { %v1101_v45 = vor.u32 1.1754944e-38, %v1100_v33  ;;  %vm1099_vm8 = vcmp.eq.f32.partialorder %v1098_v36, 8.507059e+37 }
  0xc4   : > { %v1077_v15 = vmul.f32 %v2007_v3, %v1076_v8  ;;  %v917_v17 = vadd.f32 %v2313_v44, %v739_v10  ;;  %v1910_v20 = vmul.f32 -1.442695, %v932_v16 }
  0xc6   : > { %v2009_v18 = vpop.eup %2008  ;;  %v1078_v19 = vadd.f32 %v2007_v3, %v1077_v15  ;;  %v1895_v21 = vmul.f32 -1.442695, %v917_v17  ;;  %2012 = vpow2.f32 %v1910_v20 }
  0xc7   : > { %v2011_v22 = vpop.eup %2010  ;;  %v1044_v24 = vadd.f32 1.0, %v2009_v18  ;;  %v689_v27 = vpop.f32.mrf.mxu2 }
  0xc8   : > { %v1082_v25 = vsel %vm1081_vm3, %v2007_v3, %v1078_v19  ;;  %v1090_v26 = vmul.f32 %v2011_v22, %v1043_v4  ;;  %v779_v31 = vadd.f32 %v778_v61, %v689_v27  ;;  %v2336_v32 = vpop.f32.mrf.mxu1  ;;  %vm1095_vm5 = vweird.f32 %v2011_v22 }
  0xc9   : > { %v1087_v28 = vsel %vm1084_vm4, %v1086_v23, %v1082_v25  ;;  %2014 = vrcp.f32 %v1044_v24  ;;  %v652_v29 = vpop.f32.mrf.mxu0  ;;  %vm1096_vm7 = vmor %vm1094_vm6, %vm1095_vm5  ;;  %v1113_v58 = vand.u32 2147483647, %v1044_v24  ;;  %v1115_v60 = vand.u32 2147483648, %v1044_v24 }
  0xca   : > { %1554 = vst [vmem:[%s2333_s19] sm:$0xff] %v1087_v28  ;;  %v1091_v30 = vsub.f32 1.0, %v1090_v26  ;;  %2016 = vpow2.f32 %v1895_v21  ;;  %v742_v34 = vadd.f32 %v741_v54, %v652_v29  ;;  %v933_v37 = vadd.f32 %v2313_v44, %v779_v31 }
  0xcb   : > { %vm1109_vm10 = vweird.f32 %v1044_v24  ;;  %vm1114_vm12 = vcmp.eq.f32.partialorder %v1113_v58, 8.507059e+37  ;;  %v1116_v6 = vor.u32 1.1754944e-38, %v1115_v60 }
  0xcc   : > { %v1092_v35 = vmul.f32 %v2011_v22, %v1091_v30  ;;  %v918_v38 = vadd.f32 %v2313_v44, %v742_v34  ;;  %v2013_v40 = vpop.eup %2012  ;;  %v1911_v42 = vmul.f32 -1.442695, %v933_v37 }
  0xcd   : > { %v2342_v46 = vadd.f32 1.0, %v2013_v40 }
  0xce   : > { %v1093_v41 = vadd.f32 %v2011_v22, %v1092_v35  ;;  %v1896_v47 = vmul.f32 -1.442695, %v918_v38  ;;  %2018 = vpow2.f32 %v1911_v42 }
  0xcf   : > { %v2015_v43 = vpop.eup %2014  ;;  %v692_v52 = vpop.f32.mrf.mxu2  ;;  %2020 = vrcp.f32 %v2342_v46  ;;  %v1353_v13 = vand.u32 2147483647, %v2342_v46  ;;  %v1355_v17 = vand.u32 2147483648, %v2342_v46  ;;  %vm1349_vm13 = vweird.f32 %v2342_v46 }
  0xd0   : > { %v2017_v48 = vpop.eup %2016  ;;  %v1097_v49 = vsel %vm1096_vm7, %v2011_v22, %v1093_v41  ;;  %v1105_v50 = vmul.f32 %v2015_v43, %v1044_v24  ;;  %2022 = vpow2.f32 %v1896_v47  ;;  %v2348_v57 = vpop.f32.mrf.mxu1  ;;  %v782_v61 = vadd.f32 %v781_v14, %v692_v52 }
  0xd1   : > { %v1102_v53 = vsel %vm1099_vm8, %v1101_v45, %v1097_v49  ;;  %v654_v54 = vpop.f32.mrf.mxu0  ;;  %v2346_v56 = vadd.f32 1.0, %v2017_v48  ;;  %vm1110_vm9 = vweird.f32 %v2015_v43  ;;  %vm2371_vm15 = vcmp.eq.f32.partialorder %v1353_v13, 8.507059e+37 }
  0xd2   : > { %1555 = vst [vmem:[%s2333_s19 + $0x8] sm:$0xff] %v1102_v53  ;;  %v1106_v55 = vsub.f32 1.0, %v1105_v50  ;;  %v744_v62 = vadd.f32 %v2321_v63, %v654_v54  ;;  %v934_v1 = vadd.f32 %v2313_v44, %v782_v61  ;;  %vm1111_vm11 = vmor %vm1109_vm10, %vm1110_vm9  ;;  %v2356_v63 = vpop.f32.mrf.mxu3  ;;  %v1356_v28 = vor.u32 1.1754944e-38, %v1355_v17 }
  0xd3   : > { %2024 = vrcp.f32 %v2346_v56  ;;  %v1128_v18 = vand.u32 2147483647, %v2346_v56  ;;  %v1130_v22 = vand.u32 2147483648, %v2346_v56  ;;  %vm1124_vm0 = vweird.f32 %v2346_v56 }
  0xd4   : > { %v1107_v0 = vmul.f32 %v2015_v43, %v1106_v55  ;;  %v919_v2 = vadd.f32 %v2313_v44, %v744_v62  ;;  %v2019_v3 = vpop.eup %2018  ;;  %v1912_v8 = vmul.f32 -1.442695, %v934_v1 }
  0xd5   : > { %v2021_v5 = vpop.eup %2020  ;;  %v2354_v7 = vadd.f32 1.0, %v2019_v3  ;;  %vm2378_vm1 = vcmp.eq.f32.partialorder %v1128_v18, 8.507059e+37  ;;  %v1131_v34 = vor.u32 1.1754944e-38, %v1130_v22 }
  0xd6   : > { %v1108_v4 = vadd.f32 %v2015_v43, %v1107_v0  ;;  %v2023_v9 = vpop.eup %2022  ;;  %v1345_v12 = vmul.f32 %v2021_v5, %v2342_v46  ;;  %v1897_v14 = vmul.f32 -1.442695, %v919_v2  ;;  %vm1350_vm14 = vweird.f32 %v2021_v5 }
  0xd7   : > { %v694_v15 = vpop.f32.mrf.mxu2  ;;  %2026 = vrcp.f32 %v2354_v7  ;;  %v2365_v23 = vadd.f32 1.0, %v2023_v9  ;;  %vm1351_vm2 = vmor %vm1349_vm13, %vm1350_vm14  ;;  %v1368_v38 = vand.u32 2147483647, %v2354_v7  ;;  %vm1364_vm6 = vweird.f32 %v2354_v7 }
  0xd8   : > { %v1112_v10 = vsel %vm1111_vm11, %v2015_v43, %v1108_v4  ;;  %v1346_v21 = vsub.f32 1.0, %v1345_v12  ;;  %2028 = vpow2.f32 %v1912_v8  ;;  %v2367_v24 = vpop.f32.mrf.mxu1  ;;  %v784_v30 = vadd.f32 %v2340_v39, %v694_v15 }
  0xd9   : > { %v1117_v16 = vsel %vm1114_vm12, %v1116_v6, %v1112_v10  ;;  %v657_v19 = vpop.f32.mrf.mxu0  ;;  %v2025_v20 = vpop.eup %2024  ;;  %2030 = vpow2.f32 %v1897_v14  ;;  %v1370_v43 = vand.u32 2147483648, %v2354_v7  ;;  %v1143_v49 = vand.u32 2147483647, %v2365_v23 }
  0xda   : > { %1556 = vst [vmem:[%s2333_s19 + $0x10] sm:$0xff] %v1117_v16  ;;  %v1120_v25 = vmul.f32 %v2025_v20, %v2346_v56  ;;  %v1347_v26 = vmul.f32 %v2021_v5, %v1346_v21  ;;  %2032 = vrcp.f32 %v2365_v23  ;;  %v747_v35 = vadd.f32 %v2324_v11, %v657_v19  ;;  %v788_v52 = vpop.f32.mrf.mxu3 }
  0xdb   : > { %vm1125_vm3 = vweird.f32 %v2025_v20  ;;  %v935_v40 = vadd.f32 %v2313_v44, %v784_v30  ;;  %v1145_v58 = vand.u32 2147483648, %v2365_v23  ;;  %vm1369_vm7 = vcmp.eq.f32.partialorder %v1368_v38, 8.507059e+37 }
  0xdc   : > { %v1121_v29 = vsub.f32 1.0, %v1120_v25  ;;  %v1348_v31 = vadd.f32 %v2021_v5, %v1347_v26  ;;  %v920_v45 = vadd.f32 %v2313_v44, %v747_v35  ;;  %vm1126_vm4 = vmor %vm1124_vm0, %vm1125_vm3  ;;  %v1371_v8 = vor.u32 1.1754944e-38, %v1370_v43 }
  0xdd   : > { %v2027_v36 = vpop.eup %2026  ;;  %v1913_v61 = vmul.f32 -1.442695, %v935_v40  ;;  %vm1139_vm8 = vweird.f32 %v2365_v23  ;;  %vm2414_vm11 = vcmp.eq.f32.partialorder %v1143_v49, 8.507059e+37 }
  0xde   : > { %v1122_v37 = vmul.f32 %v2025_v20, %v1121_v29  ;;  %v2029_v39 = vpop.eup %2028  ;;  %v1352_v41 = vsel %vm1351_vm2, %v2021_v5, %v1348_v31  ;;  %v1360_v42 = vmul.f32 %v2027_v36, %v2354_v7  ;;  %vm1365_vm5 = vweird.f32 %v2027_v36 }
  0xdf   : > { %v697_v11 = vpop.f32.mrf.mxu2  ;;  %v2031_v47 = vpop.eup %2030  ;;  %v1357_v46 = vsel %vm2371_vm15, %v1356_v28, %v1352_v41  ;;  %v2393_v50 = vadd.f32 1.0, %v2029_v39  ;;  %v1898_v4 = vmul.f32 -1.442695, %v920_v45  ;;  %vm1366_vm9 = vmor %vm1364_vm6, %vm1365_vm5  ;;  %v1146_v7 = vor.u32 1.1754944e-38, %v1145_v58 }
  0xe0   : > { %v1123_v48 = vadd.f32 %v2025_v20, %v1122_v37  ;;  %v2033_v54 = vpop.eup %2032  ;;  %1572 = vst [vmem:[%s2333_s19 + $0x90] sm:$0xff] %v1357_v46  ;;  %v1361_v55 = vsub.f32 1.0, %v1360_v42  ;;  %v2400_v60 = vadd.f32 1.0, %v2031_v47  ;;  %v2402_v62 = vpop.f32.mrf.mxu1  ;;  %v787_v2 = vadd.f32 %v2356_v63, %v697_v11 }
  0xe1   : > { %v659_v53 = vpop.f32.mrf.mxu0  ;;  %v1135_v1 = vmul.f32 %v2033_v54, %v2365_v23  ;;  %2034 = vrcp.f32 %v2393_v50  ;;  %vm1140_vm10 = vweird.f32 %v2033_v54  ;;  %vm1379_vm13 = vweird.f32 %v2393_v50 }
  0xe2   : > { %v1127_v0 = vsel %vm1126_vm4, %v2025_v20, %v1123_v48  ;;  %v1362_v56 = vmul.f32 %v2027_v36, %v1361_v55  ;;  %2036 = vrcp.f32 %v2400_v60  ;;  %v936_v9 = vadd.f32 %v2313_v44, %v787_v2  ;;  %vm1141_vm12 = vmor %vm1139_vm8, %vm1140_vm10  ;;  %v791_v28 = vpop.f32.mrf.mxu3 }
  0xe3   : > { %v1132_v3 = vsel %vm2378_vm1, %v1131_v34, %v1127_v0  ;;  %v1136_v5 = vsub.f32 1.0, %v1135_v1  ;;  %2038 = vpow2.f32 %v1913_v61  ;;  %v749_v18 = vadd.f32 %v2336_v32, %v659_v53 }
  0xe4   : > { %1557 = vst [vmem:[%s2333_s19 + $0x18] sm:$0xff] %v1132_v3  ;;  %v1363_v6 = vadd.f32 %v2027_v36, %v1362_v56  ;;  %2040 = vpow2.f32 %v1898_v4  ;;  %v1914_v17 = vmul.f32 -1.442695, %v936_v9  ;;  %v1383_v27 = vand.u32 2147483647, %v2393_v50 }
  0xe5   : > { %v1137_v63 = vmul.f32 %v2033_v54, %v1136_v5  ;;  %v921_v32 = vadd.f32 %v2313_v44, %v749_v18  ;;  %v1385_v30 = vand.u32 2147483648, %v2393_v50  ;;  %v1160_v42 = vand.u32 2147483648, %v2400_v60 }
  0xe6   : > { %v1367_v10 = vsel %vm1366_vm9, %v2027_v36, %v1363_v6  ;;  %2042 = vpow2.f32 %v1914_v17  ;;  %vm1154_vm1 = vweird.f32 %v2400_v60  ;;  %vm1384_vm2 = vcmp.eq.f32.partialorder %v1383_v27, 8.507059e+37 }
  0xe7   : > { %v699_v13 = vpop.f32.mrf.mxu2  ;;  %v2035_v14 = vpop.eup %2034  ;;  %v1372_v15 = vsel %vm1369_vm7, %v1371_v8, %v1367_v10  ;;  %v1138_v16 = vadd.f32 %v2033_v54, %v1137_v63  ;;  %v1899_v35 = vmul.f32 -1.442695, %v921_v32  ;;  %v1386_v49 = vor.u32 1.1754944e-38, %v1385_v30 }
  0xe8   : > { %1573 = vst [vmem:[%s2333_s19 + $0x98] sm:$0xff] %v1372_v15  ;;  %v1375_v20 = vmul.f32 %v2035_v14, %v2393_v50  ;;  %v789_v21 = vadd.f32 %v788_v52, %v699_v13  ;;  %v2037_v25 = vpop.eup %2036  ;;  %v2432_v33 = vpop.f32.mrf.mxu1  ;;  %vm1380_vm14 = vweird.f32 %v2035_v14  ;;  %v1161_v61 = vor.u32 1.1754944e-38, %v1160_v42 }
  0xe9   : > { %v662_v19 = vpop.f32.mrf.mxu0  ;;  %v1142_v26 = vsel %vm1141_vm12, %v2033_v54, %v1138_v16  ;;  %v1150_v31 = vmul.f32 %v2037_v25, %v2400_v60  ;;  %v2039_v34 = vpop.eup %2038  ;;  %vm1155_vm15 = vweird.f32 %v2037_v25  ;;  %2044 = vpow2.f32 %v1899_v35  ;;  %vm1381_vm0 = vmor %vm1379_vm13, %vm1380_vm14 }
  0xea   : > { %v752_v22 = vadd.f32 %v2348_v57, %v662_v19  ;;  %v1147_v23 = vsel %vm2414_vm11, %v1146_v7, %v1142_v26  ;;  %v1376_v29 = vsub.f32 1.0, %v1375_v20  ;;  %v1158_v57 = vand.u32 2147483647, %v2400_v60  ;;  %v2041_v37 = vpop.eup %2040  ;;  %vm1156_vm3 = vmor %vm1154_vm1, %vm1155_vm15  ;;  %v793_v4 = vpop.f32.mrf.mxu3 }
  0xeb   : > { %1558 = vst [vmem:[%s2333_s19 + $0x20] sm:$0xff] %v1147_v23  ;;  %v937_v36 = vadd.f32 %v2313_v44, %v789_v21  ;;  %v1151_v40 = vsub.f32 1.0, %v1150_v31  ;;  %v2437_v39 = vadd.f32 1.0, %v2039_v34  ;;  %v2441_v43 = vadd.f32 1.0, %v2041_v37 }
  0xec   : > { %v1377_v38 = vmul.f32 %v2035_v14, %v1376_v29  ;;  %v922_v41 = vadd.f32 %v2313_v44, %v752_v22  ;;  %v2043_v48 = vpop.eup %2042  ;;  %vm1159_vm4 = vcmp.eq.f32.partialorder %v1158_v57, 8.507059e+37 }
  0xed   : > { %v1152_v11 = vmul.f32 %v2037_v25, %v1151_v40  ;;  %2046 = vrcp.f32 %v2437_v39  ;;  %v1915_v47 = vmul.f32 -1.442695, %v937_v36  ;;  %v2450_v0 = vadd.f32 1.0, %v2043_v48 }
  0xee   : > { %v1378_v45 = vadd.f32 %v2035_v14, %v1377_v38  ;;  %2048 = vrcp.f32 %v2441_v43  ;;  %v1900_v55 = vmul.f32 -1.442695, %v922_v41  ;;  %v1398_v1 = vand.u32 2147483647, %v2437_v39 }
  0xef   : > { %v702_v46 = vpop.f32.mrf.mxu2  ;;  %v1153_v54 = vadd.f32 %v2037_v25, %v1152_v11  ;;  %2050 = vpow2.f32 %v1915_v47  ;;  %v2045_v60 = vpop.eup %2044  ;;  %v1400_v3 = vand.u32 2147483648, %v2437_v39  ;;  %v1173_v56 = vand.u32 2147483647, %v2441_v43 }
  0xf0   : > { %v1382_v53 = vsel %vm1381_vm0, %v2035_v14, %v1378_v45  ;;  %2052 = vrcp.f32 %v2450_v0  ;;  %v1175_v6 = vand.u32 2147483648, %v2441_v43  ;;  %v2459_v8 = vadd.f32 1.0, %v2045_v60  ;;  %v2461_v9 = vpop.f32.mrf.mxu1 }
  0xf1   : > { %v664_v52 = vpop.f32.mrf.mxu0  ;;  %v1387_v58 = vsel %vm1384_vm2, %v1386_v49, %v1382_v53  ;;  %v1157_v50 = vsel %vm1156_vm3, %v2037_v25, %v1153_v54  ;;  %2054 = vpow2.f32 %v1900_v55  ;;  %v792_v63 = vadd.f32 %v791_v28, %v702_v46 }
  0xf2   : > { %1574 = vst [vmem:[%s2333_s19 + $0xa0] sm:$0xff] %v1387_v58  ;;  %v1162_v2 = vsel %vm1159_vm4, %v1161_v61, %v1157_v50  ;;  %vm1394_vm5 = vweird.f32 %v2437_v39  ;;  %vm1169_vm6 = vweird.f32 %v2441_v43  ;;  %v1413_v13 = vand.u32 2147483647, %v2450_v0  ;;  %v796_v48 = vpop.f32.mrf.mxu3 }
  0xf3   : > { %v2047_v5 = vpop.eup %2046  ;;  %1559 = vst [vmem:[%s2333_s19 + $0x28] sm:$0xff] %v1162_v2  ;;  %v1415_v14 = vand.u32 2147483648, %v2450_v0  ;;  %2056 = vrcp.f32 %v2459_v8  ;;  %vm2470_vm7 = vcmp.eq.f32.partialorder %v1398_v1, 8.507059e+37  ;;  %v1401_v18 = vor.u32 1.1754944e-38, %v1400_v3 }
  0xf4   : > { %v2049_v10 = vpop.eup %2048  ;;  %v1390_v12 = vmul.f32 %v2047_v5, %v2437_v39  ;;  %vm2474_vm8 = vcmp.eq.f32.partialorder %v1173_v56, 8.507059e+37  ;;  %v1176_v25 = vor.u32 1.1754944e-38, %v1175_v6  ;;  %vm1409_vm9 = vweird.f32 %v2450_v0 }
  0xf5   : > { %v1165_v7 = vmul.f32 %v2049_v10, %v2441_v43  ;;  %v2051_v21 = vpop.eup %2050  ;;  %v938_v26 = vadd.f32 %v2313_v44, %v792_v63  ;;  %vm1395_vm10 = vweird.f32 %v2047_v5  ;;  %v754_v23 = vadd.f32 %v2367_v24, %v664_v52 }
  0xf6   : > { %v1391_v16 = vsub.f32 1.0, %v1390_v12  ;;  %v2053_v27 = vpop.eup %2052  ;;  %v2480_v28 = vadd.f32 1.0, %v2051_v21  ;;  %vm1170_vm11 = vweird.f32 %v2049_v10  ;;  %vm2484_vm12 = vcmp.eq.f32.partialorder %v1413_v13, 8.507059e+37  ;;  %vm1396_vm14 = vmor %vm1394_vm5, %vm1395_vm10 }
  0xf7   : > { %v704_v15 = vpop.f32.mrf.mxu2  ;;  %v1166_v22 = vsub.f32 1.0, %v1165_v7  ;;  %v2055_v29 = vpop.eup %2054  ;;  %v1405_v31 = vmul.f32 %v2053_v27, %v2450_v0  ;;  %v1416_v57 = vor.u32 1.1754944e-38, %v1415_v14  ;;  %vm1184_vm13 = vweird.f32 %v2459_v8  ;;  %vm1171_vm15 = vmor %vm1169_vm6, %vm1170_vm11 }
  0xf8   : > { %v1392_v32 = vmul.f32 %v2047_v5, %v1391_v16  ;;  %v1188_v36 = vand.u32 2147483647, %v2459_v8  ;;  %v1190_v37 = vand.u32 2147483648, %v2459_v8  ;;  %2058 = vrcp.f32 %v2480_v28  ;;  %v2504_v53 = vpop.f32.mrf.mxu1 }
  0xf9   : > { %v667_v20 = vpop.f32.mrf.mxu0  ;;  %v1167_v30 = vmul.f32 %v2049_v10, %v1166_v22  ;;  %v2057_v24 = vpop.eup %2056  ;;  %v1406_v40 = vsub.f32 1.0, %v1405_v31  ;;  %v2495_v41 = vadd.f32 1.0, %v2055_v29  ;;  %v1916_v42 = vmul.f32 -1.442695, %v938_v26 }
  0xfa   : > { %v1393_v35 = vadd.f32 %v2047_v5, %v1392_v32  ;;  %v1180_v11 = vmul.f32 %v2057_v24, %v2459_v8  ;;  %v923_v47 = vadd.f32 %v2313_v44, %v754_v23  ;;  %v794_v46 = vadd.f32 %v793_v4, %v704_v15  ;;  %v798_v31 = vpop.f32.mrf.mxu3 }
  0xfb   : > { %v1168_v38 = vadd.f32 %v2049_v10, %v1167_v30  ;;  %v1407_v52 = vmul.f32 %v2053_v27, %v1406_v40  ;;  %vm1410_vm0 = vweird.f32 %v2053_v27  ;;  %v1428_v58 = vand.u32 2147483647, %v2480_v28 }
  0xfc   : > { %v1397_v45 = vsel %vm1396_vm14, %v2047_v5, %v1393_v35  ;;  %v1181_v55 = vsub.f32 1.0, %v1180_v11  ;;  %2060 = vrcp.f32 %v2495_v41  ;;  %vm1185_vm1 = vweird.f32 %v2057_v24  ;;  %vm1411_vm2 = vmor %vm1409_vm9, %vm1410_vm0 }
  0xfd   : > { %v1402_v39 = vsel %vm2470_vm7, %v1401_v18, %v1397_v45  ;;  %v1172_v49 = vsel %vm1171_vm15, %v2049_v10, %v1168_v38  ;;  %v1408_v50 = vadd.f32 %v2053_v27, %v1407_v52  ;;  %v1430_v1 = vand.u32 2147483648, %v2480_v28  ;;  %vm1186_vm5 = vmor %vm1184_vm13, %vm1185_vm1 }
  0xfe   : > { %1575 = vst [vmem:[%s2333_s19 + $0xa8] sm:$0xff] %v1402_v39  ;;  %v1177_v43 = vsel %vm2474_vm8, %v1176_v25, %v1172_v49  ;;  %2062 = vpow2.f32 %v1916_v42  ;;  %v2059_v60 = vpop.eup %2058  ;;  %v1182_v2 = vmul.f32 %v2057_v24, %v1181_v55  ;;  %v1901_v3 = vmul.f32 -1.442695, %v923_v47 }
  0xff   : > { %v707_v54 = vpop.f32.mrf.mxu2  ;;  %1560 = vst [vmem:[%s2333_s19 + $0x30] sm:$0xff] %v1177_v43  ;;  %v939_v56 = vadd.f32 %v2313_v44, %v794_v46  ;;  %v757_v4 = vadd.f32 %v2402_v62, %v667_v20  ;;  %v1412_v5 = vsel %vm1411_vm2, %v2053_v27, %v1408_v50  ;;  %vm2518_vm3 = vcmp.eq.f32.partialorder %v1188_v36, 8.507059e+37 }
 0x100   : > { %v1191_v63 = vor.u32 1.1754944e-38, %v1190_v37  ;;  %v1420_v10 = vmul.f32 %v2059_v60, %v2480_v28  ;;  %v1417_v12 = vsel %vm2484_vm12, %v1416_v57, %v1412_v5  ;;  %v1183_v7 = vadd.f32 %v2057_v24, %v1182_v2  ;;  %v2545_v34 = vpop.f32.mrf.mxu1 }
 0x101   : > { %v669_v61 = vpop.f32.mrf.mxu0  ;;  %vm1424_vm4 = vweird.f32 %v2480_v28  ;;  %2064 = vpow2.f32 %v1901_v3  ;;  %1576 = vst [vmem:[%s2333_s19 + $0xb0] sm:$0xff] %v1417_v12  ;;  %v1917_v0 = vmul.f32 -1.442695, %v939_v56  ;;  %v924_v13 = vadd.f32 %v2313_v44, %v757_v4 }
 0x102   : > { %v1421_v62 = vsub.f32 1.0, %v1420_v10  ;;  %v797_v14 = vadd.f32 %v796_v48, %v707_v54  ;;  %v2061_v15 = vpop.eup %2060  ;;  %v1187_v16 = vsel %vm1186_vm5, %v2057_v24, %v1183_v7  ;;  %vm2531_vm6 = vcmp.eq.f32.partialorder %v1428_v58, 8.507059e+37 }
 0x103   : > { %v1431_v18 = vor.u32 1.1754944e-38, %v1430_v1  ;;  %v759_v19 = vadd.f32 %v2432_v33, %v669_v61  ;;  %v1192_v8 = vsel %vm2518_vm3, %v1191_v63, %v1187_v16  ;;  %vm1425_vm7 = vweird.f32 %v2059_v60 }
 0x104   : > { %v2063_v20 = vpop.eup %2062  ;;  %v1422_v21 = vmul.f32 %v2059_v60, %v1421_v62  ;;  %v1195_v22 = vmul.f32 %v2061_v15, %v2495_v41  ;;  %1561 = vst [vmem:[%s2333_s19 + $0x38] sm:$0xff] %v1192_v8  ;;  %2066 = vpow2.f32 %v1917_v0  ;;  %v1902_v27 = vmul.f32 -1.442695, %v924_v13  ;;  %vm1426_vm8 = vmor %vm1424_vm4, %vm1425_vm7 }
 0x105   : > { %v2540_v26 = vadd.f32 1.0, %v2063_v20  ;;  %v940_v32 = vadd.f32 %v2313_v44, %v797_v14  ;;  %v1203_v33 = vand.u32 2147483647, %v2495_v41  ;;  %v1205_v30 = vand.u32 2147483648, %v2495_v41 }
 0x106   : > { %v1423_v23 = vadd.f32 %v2059_v60, %v1422_v21  ;;  %v1196_v29 = vsub.f32 1.0, %v1195_v22  ;;  %vm1200_vm9 = vweird.f32 %v2061_v15  ;;  %v925_v35 = vadd.f32 %v2313_v44, %v759_v19 }
 0x107   : > { %v709_v25 = vpop.f32.mrf.mxu2  ;;  %v2065_v57 = vpop.eup %2064  ;;  %2068 = vrcp.f32 %v2540_v26  ;;  %v1918_v45 = vmul.f32 -1.442695, %v940_v32  ;;  %vm1199_vm10 = vweird.f32 %v2495_v41  ;;  %vm1204_vm11 = vcmp.eq.f32.partialorder %v1203_v33, 8.507059e+37 }
 0x108   : > { %v799_v36 = vadd.f32 %v798_v31, %v709_v25  ;;  %v1427_v24 = vsel %vm1426_vm8, %v2059_v60, %v1423_v23  ;;  %v1197_v38 = vmul.f32 %v2061_v15, %v1196_v29  ;;  %v2552_v40 = vadd.f32 1.0, %v2065_v57  ;;  %vm1201_vm12 = vmor %vm1199_vm10, %vm1200_vm9  ;;  %v2579_v6 = vpop.f32.mrf.mxu1 }
 0x109   : > { %v672_v37 = vpop.f32.mrf.mxu0  ;;  %2070 = vpow2.f32 %v1902_v27  ;;  %v1432_v42 = vsel %vm2531_vm6, %v1431_v18, %v1427_v24  ;;  %v1206_v47 = vor.u32 1.1754944e-38, %v1205_v30  ;;  %v1903_v46 = vmul.f32 -1.442695, %v925_v35  ;;  %v801_v18 = vpop.f32.mrf.mxu3 }
 0x10a   : > { %1577 = vst [vmem:[%s2333_s19 + $0xb8] sm:$0xff] %v1432_v42  ;;  %v1198_v11 = vadd.f32 %v2061_v15, %v1197_v38  ;;  %2072 = vrcp.f32 %v2552_v40  ;;  %v2067_v28 = vpop.eup %2066  ;;  %v941_v48 = vadd.f32 %v2313_v44, %v799_v36  ;;  %v1443_v49 = vand.u32 2147483647, %v2540_v26 }
 0x10b   : > { %2074 = vpow2.f32 %v1918_v45  ;;  %v1445_v52 = vand.u32 2147483648, %v2540_v26  ;;  %v2563_v54 = vadd.f32 1.0, %v2067_v28  ;;  %v1218_v55 = vand.u32 2147483647, %v2552_v40 }
 0x10c   : > { %v1202_v39 = vsel %vm1201_vm12, %v2061_v15, %v1198_v11  ;;  %2076 = vpow2.f32 %v1903_v46  ;;  %v1919_v58 = vmul.f32 -1.442695, %v941_v48  ;;  %v1220_v1 = vand.u32 2147483648, %v2552_v40 }
 0x10d   : > { %v2069_v41 = vpop.eup %2068  ;;  %v1207_v43 = vsel %vm1204_vm11, %v1206_v47, %v1202_v39  ;;  %2078 = vrcp.f32 %v2563_v54  ;;  %vm1439_vm13 = vweird.f32 %v2540_v26  ;;  %v762_v2 = vadd.f32 %v2461_v9, %v672_v37 }
 0x10e   : > { %1562 = vst [vmem:[%s2333_s19 + $0x40] sm:$0xff] %v1207_v43  ;;  %v1435_v50 = vmul.f32 %v2069_v41, %v2540_v26  ;;  %vm2574_vm14 = vcmp.eq.f32.partialorder %v1443_v49, 8.507059e+37  ;;  %v1446_v5 = vor.u32 1.1754944e-38, %v1445_v52  ;;  %vm1214_vm15 = vweird.f32 %v2552_v40 }
 0x10f   : > { %v2071_v61 = vpop.eup %2070  ;;  %vm2582_vm0 = vcmp.eq.f32.partialorder %v1218_v55, 8.507059e+37  ;;  %v1458_v9 = vand.u32 2147483647, %v2563_v54  ;;  %2080 = vpow2.f32 %v1919_v58  ;;  %v712_v7 = vpop.f32.mrf.mxu2  ;;  %vm1440_vm1 = vweird.f32 %v2069_v41 }
 0x110   : > { %v2571_v60 = vadd.f32 1.0, %v2071_v61  ;;  %v2073_v3 = vpop.eup %2072  ;;  %v1436_v56 = vsub.f32 1.0, %v1435_v50  ;;  %v1221_v13 = vor.u32 1.1754944e-38, %v1220_v1  ;;  %vm1454_vm2 = vweird.f32 %v2563_v54  ;;  %vm1441_vm3 = vmor %vm1439_vm13, %vm1440_vm1  ;;  %v771_v46 = vpop.f32.mrf.mxu1 }
 0x111   : > { %v2075_v63 = vpop.eup %2074  ;;  %v1210_v10 = vmul.f32 %v2073_v3, %v2552_v40  ;;  %v674_v62 = vpop.f32.mrf.mxu0  ;;  %v1460_v16 = vand.u32 2147483648, %v2563_v54  ;;  %v926_v19 = vadd.f32 %v2313_v44, %v762_v2  ;;  %v802_v22 = vadd.f32 %v801_v18, %v712_v7 }
 0x112   : > { %v1437_v0 = vmul.f32 %v2069_v41, %v1436_v56  ;;  %2082 = vrcp.f32 %v2571_v60  ;;  %v2077_v14 = vpop.eup %2076  ;;  %v2590_v17 = vadd.f32 1.0, %v2075_v63  ;;  %v764_v25 = vadd.f32 %v2504_v53, %v674_v62 }
 0x113   : > { %v1211_v15 = vsub.f32 1.0, %v1210_v10  ;;  %v2079_v20 = vpop.eup %2078  ;;  %v2593_v21 = vadd.f32 1.0, %v2077_v14  ;;  %vm1215_vm4 = vweird.f32 %v2073_v3  ;;  %vm2600_vm5 = vcmp.eq.f32.partialorder %v1458_v9, 8.507059e+37 }
 0x114   : > { %v1438_v8 = vadd.f32 %v2069_v41, %v1437_v0  ;;  %v1450_v32 = vmul.f32 %v2079_v20, %v2563_v54  ;;  %v1233_v33 = vand.u32 2147483647, %v2571_v60  ;;  %v1235_v30 = vand.u32 2147483648, %v2571_v60  ;;  %vm1216_vm6 = vmor %vm1214_vm15, %vm1215_vm4  ;;  %v803_v0 = vpop.f32.mrf.mxu3 }
 0x115   : > { %v1212_v27 = vmul.f32 %v2073_v3, %v1211_v15  ;;  %2084 = vrcp.f32 %v2590_v17  ;;  %v2081_v53 = vpop.eup %2080  ;;  %v1904_v35 = vmul.f32 -1.442695, %v926_v19  ;;  %v1461_v37 = vor.u32 1.1754944e-38, %v1460_v16 }
 0x116   : > { %v1442_v29 = vsel %vm1441_vm3, %v2069_v41, %v1438_v8  ;;  %v1451_v57 = vsub.f32 1.0, %v1450_v32  ;;  %vm1229_vm7 = vweird.f32 %v2571_v60  ;;  %2086 = vrcp.f32 %v2593_v21 }
 0x117   : > { %v1447_v26 = vsel %vm2574_vm14, %v1446_v5, %v1442_v29  ;;  %v1213_v31 = vadd.f32 %v2073_v3, %v1212_v27  ;;  %v942_v24 = vadd.f32 %v2313_v44, %v802_v22  ;;  %vm1455_vm8 = vweird.f32 %v2079_v20 }
 0x118   : > { %v2083_v36 = vpop.eup %2082  ;;  %1578 = vst [vmem:[%s2333_s19 + $0xc0] sm:$0xff] %v1447_v26  ;;  %v1452_v42 = vmul.f32 %v2079_v20, %v1451_v57  ;;  %vm2618_vm9 = vcmp.eq.f32.partialorder %v1233_v33, 8.507059e+37  ;;  %v1236_v40 = vor.u32 1.1754944e-38, %v1235_v30  ;;  %v1473_v47 = vand.u32 2147483647, %v2590_v17  ;;  %vm1456_vm10 = vmor %vm1454_vm2, %vm1455_vm8 }
 0x119   : > { %v1217_v38 = vsel %vm1216_vm6, %v2073_v3, %v1213_v31  ;;  %v1225_v45 = vmul.f32 %v2083_v36, %v2571_v60  ;;  %v2624_v49 = vadd.f32 1.0, %v2081_v53  ;;  %2088 = vpow2.f32 %v1904_v35  ;;  %v677_v33 = vpop.f32.mrf.mxu0 }
 0x11a   : > { %v1222_v11 = vsel %vm2582_vm0, %v1221_v13, %v1217_v38  ;;  %v1453_v48 = vadd.f32 %v2079_v20, %v1452_v42  ;;  %vm1230_vm11 = vweird.f32 %v2083_v36  ;;  %vm1469_vm12 = vweird.f32 %v2590_v17  ;;  %v2650_v13 = vld [vmem:[%s2801_s2] ss:$0 sm:$0xff]  ;;  %v773_v42 = vpop.f32.mrf.mxu1 }
 0x11b   : > { %1563 = vst [vmem:[%s2333_s19 + $0x48] sm:$0xff] %v1222_v11  ;;  %v1226_v39 = vsub.f32 1.0, %v1225_v45  ;;  %v2085_v52 = vpop.eup %2084  ;;  %v1920_v41 = vmul.f32 -1.442695, %v942_v24  ;;  %v927_v43 = vadd.f32 %v2313_v44, %v764_v25  ;;  %v772_v50 = vadd.f32 %v771_v46, %v2316_v51  ;;  %v714_v51 = vpop.f32.mrf.mxu2  ;;  %vm1231_vm14 = vmor %vm1229_vm7, %vm1230_vm11 }
 0x11c   : > { %v1457_v55 = vsel %vm1456_vm10, %v2079_v20, %v1453_v48  ;;  %v1465_v61 = vmul.f32 %v2085_v52, %v2590_v17  ;;  %v2087_v1 = vpop.eup %2086  ;;  %vm2634_vm13 = vcmp.eq.f32.partialorder %v1473_v47, 8.507059e+37  ;;  %v1475_v54 = vand.u32 2147483648, %v2590_v17 }
 0x11d   : > { %v1227_v58 = vmul.f32 %v2083_v36, %v1226_v39  ;;  %v1462_v2 = vsel %vm2600_vm5, %v1461_v37, %v1457_v55  ;;  %2090 = vrcp.f32 %v2624_v49  ;;  %v1240_v4 = vmul.f32 %v2087_v1, %v2593_v21 }
 0x11e   : > { %1579 = vst [vmem:[%s2333_s19 + $0xc8] sm:$0xff] %v1462_v2  ;;  %v1466_v56 = vsub.f32 1.0, %v1465_v61  ;;  %v1248_v5 = vand.u32 2147483647, %v2593_v21  ;;  %vm1470_vm15 = vweird.f32 %v2085_v52  ;;  %v1250_v63 = vand.u32 2147483648, %v2593_v21 }
 0x11f   : > { %v1228_v44 = vadd.f32 %v2083_v36, %v1227_v58  ;;  %2092 = vpow2.f32 %v1920_v41  ;;  %v1905_v10 = vmul.f32 -1.442695, %v927_v43  ;;  %v2089_v12 = vpop.eup %2088  ;;  %v1241_v62 = vsub.f32 1.0, %v1240_v4  ;;  %vm1471_vm1 = vmor %vm1469_vm12, %vm1470_vm15  ;;  %v806_v41 = vpop.f32.mrf.mxu3 }
 0x120   : > { %v1467_v7 = vmul.f32 %v2085_v52, %v1466_v56  ;;  %v930_v14 = vadd.f32 %v2650_v13, %v772_v50  ;;  %vm1245_vm0 = vweird.f32 %v2087_v1  ;;  %v2655_v15 = vadd.f32 1.0, %v2089_v12 }
 0x121   : > { %v1232_v9 = vsel %vm1231_vm14, %v2083_v36, %v1228_v44  ;;  %2094 = vpow2.f32 %v1905_v10  ;;  %v1242_v18 = vmul.f32 %v2087_v1, %v1241_v62  ;;  %v804_v20 = vadd.f32 %v803_v0, %v714_v51 }
 0x122   : > { %v1237_v60 = vsel %vm2618_vm9, %v1236_v40, %v1232_v9  ;;  %v1468_v16 = vadd.f32 %v2085_v52, %v1467_v7  ;;  %v1908_v19 = vmul.f32 -1.442695, %v930_v14  ;;  %v1476_v22 = vor.u32 1.1754944e-38, %v1475_v54 }
 0x123   : > { %1564 = vst [vmem:[%s2333_s19 + $0x50] sm:$0xff] %v1237_v60  ;;  %v2091_v8 = vpop.eup %2090  ;;  %vm1244_vm2 = vweird.f32 %v2593_v21  ;;  %vm2662_vm3 = vcmp.eq.f32.partialorder %v1248_v5, 8.507059e+37  ;;  %2096 = vrcp.f32 %v2655_v15  ;;  %v1243_v32 = vadd.f32 %v2087_v1, %v1242_v18  ;;  %v717_v45 = vpop.f32.mrf.mxu2 }
 0x124   : > { %v1472_v27 = vsel %vm1471_vm1, %v2085_v52, %v1468_v16  ;;  %v1251_v23 = vor.u32 1.1754944e-38, %v1250_v63  ;;  %v1480_v29 = vmul.f32 %v2091_v8, %v2624_v49  ;;  %vm1246_vm4 = vmor %vm1244_vm2, %vm1245_vm0  ;;  %v1488_v21 = vand.u32 2147483647, %v2624_v49 }
 0x125   : > { %v2093_v30 = vpop.eup %2092  ;;  %v1477_v17 = vsel %vm2634_vm13, %v1476_v22, %v1472_v27  ;;  %v1490_v53 = vand.u32 2147483648, %v2624_v49  ;;  %2098 = vpow2.f32 %v1908_v19  ;;  %v1247_v26 = vsel %vm1246_vm4, %v2087_v1, %v1243_v32 }
 0x126   : > { %1580 = vst [vmem:[%s2333_s19 + $0xd0] sm:$0xff] %v1477_v17  ;;  %v1481_v31 = vsub.f32 1.0, %v1480_v29  ;;  %v2674_v57 = vadd.f32 1.0, %v2093_v30  ;;  %v943_v35 = vadd.f32 %v2650_v13, %v804_v20  ;;  %v1252_v37 = vsel %vm2662_vm3, %v1251_v23, %v1247_v26 }
 0x127   : > { %v2095_v36 = vpop.eup %2094  ;;  %v767_v24 = vadd.f32 %v2545_v34, %v677_v33  ;;  %1565 = vst [vmem:[%s2333_s19 + $0x58] sm:$0xff] %v1252_v37  ;;  %vm1484_vm5 = vweird.f32 %v2624_v49  ;;  %vm1485_vm6 = vweird.f32 %v2091_v8  ;;  %vm2683_vm7 = vcmp.eq.f32.partialorder %v1488_v21, 8.507059e+37 }
 0x128   : > { %v1482_v38 = vmul.f32 %v2091_v8, %v1481_v31  ;;  %2100 = vrcp.f32 %v2674_v57  ;;  %v2687_v40 = vadd.f32 1.0, %v2095_v36  ;;  %v1921_v47 = vmul.f32 -1.442695, %v943_v35  ;;  %vm1486_vm8 = vmor %vm1484_vm5, %vm1485_vm6 }
 0x129   : > { %v2097_v11 = vpop.eup %2096  ;;  %v928_v46 = vadd.f32 %v2650_v13, %v767_v24  ;;  %v1491_v48 = vor.u32 1.1754944e-38, %v1490_v53  ;;  %v1263_v52 = vand.u32 2147483647, %v2655_v15  ;;  %v1265_v55 = vand.u32 2147483648, %v2655_v15 }
 0x12a   : > { %v1483_v34 = vadd.f32 %v2091_v8, %v1482_v38  ;;  %v1255_v39 = vmul.f32 %v2097_v11, %v2655_v15  ;;  %2102 = vrcp.f32 %v2687_v40  ;;  %v774_v58 = vadd.f32 %v773_v42, %v2319_v59  ;;  %v679_v59 = vpop.f32.mrf.mxu0 }
 0x12b   : > { %v2099_v43 = vpop.eup %2098  ;;  %v807_v61 = vadd.f32 %v806_v41, %v717_v45  ;;  %v1503_v2 = vand.u32 2147483647, %v2674_v57  ;;  %v1505_v44 = vand.u32 2147483648, %v2674_v57  ;;  %2104 = vpow2.f32 %v1921_v47  ;;  %v719_v36 = vpop.f32.mrf.mxu2 }
 0x12c   : > { %v1487_v50 = vsel %vm1486_vm8, %v2091_v8, %v1483_v34  ;;  %v1256_v1 = vsub.f32 1.0, %v1255_v39  ;;  %v2699_v3 = vadd.f32 1.0, %v2099_v43  ;;  %v1906_v49 = vmul.f32 -1.442695, %v928_v46 }
 0x12d   : > { %v1492_v54 = vsel %vm2683_vm7, %v1491_v48, %v1487_v50  ;;  %vm1259_vm9 = vweird.f32 %v2655_v15  ;;  %vm1260_vm10 = vweird.f32 %v2097_v11  ;;  %vm2707_vm11 = vcmp.eq.f32.partialorder %v1263_v52, 8.507059e+37 }
 0x12e   : > { %v2101_v56 = vpop.eup %2100  ;;  %1581 = vst [vmem:[%s2333_s19 + $0xd8] sm:$0xff] %v1492_v54  ;;  %v1257_v4 = vmul.f32 %v2097_v11, %v1256_v1  ;;  %2106 = vrcp.f32 %v2699_v3  ;;  %v1266_v51 = vor.u32 1.1754944e-38, %v1265_v55  ;;  %vm1499_vm12 = vweird.f32 %v2674_v57  ;;  %vm1261_vm13 = vmor %vm1259_vm9, %vm1260_vm10 }
 0x12f   : > { %v1495_v63 = vmul.f32 %v2101_v56, %v2674_v57  ;;  %2108 = vpow2.f32 %v1906_v49  ;;  %v931_v12 = vadd.f32 %v2650_v13, %v774_v58  ;;  %v944_v9 = vadd.f32 %v2650_v13, %v807_v61 }
 0x130   : > { %v1258_v10 = vadd.f32 %v2097_v11, %v1257_v4  ;;  %v2103_v7 = vpop.eup %2102  ;;  %vm2715_vm14 = vcmp.eq.f32.partialorder %v1503_v2, 8.507059e+37  ;;  %v1506_v14 = vor.u32 1.1754944e-38, %v1505_v44  ;;  %v769_v60 = vadd.f32 %v2579_v6, %v679_v59 }
 0x131   : > { %v1496_v62 = vsub.f32 1.0, %v1495_v63  ;;  %v1270_v16 = vmul.f32 %v2103_v7, %v2687_v40  ;;  %v1280_v18 = vand.u32 2147483648, %v2687_v40  ;;  %v1909_v19 = vmul.f32 -1.442695, %v931_v12  ;;  %v2105_v20 = vpop.eup %2104 }
 0x132   : > { %v1262_v15 = vsel %vm1261_vm13, %v2097_v11, %v1258_v10  ;;  %vm1500_vm15 = vweird.f32 %v2101_v56  ;;  %v1922_v25 = vmul.f32 -1.442695, %v944_v9  ;;  %v2725_v23 = vadd.f32 1.0, %v2105_v20  ;;  %v808_v11 = vpop.f32.mrf.mxu3 }
 0x133   : > { %v1267_v8 = vsel %vm2707_vm11, %v1266_v51, %v1262_v15  ;;  %v1497_v22 = vmul.f32 %v2101_v56, %v1496_v62  ;;  %v1271_v32 = vsub.f32 1.0, %v1270_v16  ;;  %2110 = vpow2.f32 %v1909_v19  ;;  %vm1501_vm1 = vmor %vm1499_vm12, %vm1500_vm15 }
 0x134   : > { %v2107_v27 = vpop.eup %2106  ;;  %1566 = vst [vmem:[%s2333_s19 + $0x60] sm:$0xff] %v1267_v8  ;;  %v929_v6 = vadd.f32 %v2650_v13, %v769_v60  ;;  %vm1274_vm0 = vweird.f32 %v2687_v40  ;;  %2112 = vpow2.f32 %v1922_v25  ;;  %vm1275_vm2 = vweird.f32 %v2103_v7 }
 0x135   : > { %v1498_v29 = vadd.f32 %v2101_v56, %v1497_v22  ;;  %v1315_v33 = vmul.f32 %v2107_v27, %v2699_v3  ;;  %v2109_v30 = vpop.eup %2108  ;;  %v1272_v17 = vmul.f32 %v2103_v7, %v1271_v32  ;;  %v1278_v21 = vand.u32 2147483647, %v2687_v40  ;;  %vm1276_vm3 = vmor %vm1274_vm0, %vm1275_vm2 }
 0x136   : > { %2114 = vrcp.f32 %v2725_v23  ;;  %v1281_v26 = vor.u32 1.1754944e-38, %v1280_v18  ;;  %v2734_v35 = vadd.f32 1.0, %v2109_v30  ;;  %v1325_v38 = vand.u32 2147483648, %v2699_v3 }
 0x137   : > { %v1502_v53 = vsel %vm1501_vm1, %v2101_v56, %v1498_v29  ;;  %v1316_v31 = vsub.f32 1.0, %v1315_v33  ;;  %v1273_v24 = vadd.f32 %v2103_v7, %v1272_v17  ;;  %v1907_v57 = vmul.f32 -1.442695, %v929_v6 }
 0x138   : > { %v1507_v37 = vsel %vm2715_vm14, %v1506_v14, %v1502_v53  ;;  %vm1320_vm4 = vweird.f32 %v2107_v27  ;;  %v1323_v45 = vand.u32 2147483647, %v2699_v3  ;;  %2116 = vrcp.f32 %v2734_v35 }
 0x139   : > { %1582 = vst [vmem:[%s2333_s19 + $0xe0] sm:$0xff] %v1507_v37  ;;  %v1317_v42 = vmul.f32 %v2107_v27, %v1316_v31  ;;  %v2111_v28 = vpop.eup %2110  ;;  %v1277_v47 = vsel %vm1276_vm3, %v2103_v7, %v1273_v24  ;;  %vm1279_vm5 = vcmp.eq.f32.partialorder %v1278_v21, 8.507059e+37  ;;  %2118 = vpow2.f32 %v1907_v57 }
 0x13a   : > { %v809_v46 = vadd.f32 %v808_v11, %v719_v36  ;;  %v2113_v34 = vpop.eup %2112  ;;  %v1282_v48 = vsel %vm1279_vm5, %v1281_v26, %v1277_v47  ;;  %vm1319_vm6 = vweird.f32 %v2699_v3  ;;  %v2745_v40 = vadd.f32 1.0, %v2111_v28 }
 0x13b   : > { %v1318_v39 = vadd.f32 %v2107_v27, %v1317_v42  ;;  %1567 = vst [vmem:[%s2333_s19 + $0x68] sm:$0xff] %v1282_v48  ;;  %vm1321_vm7 = vmor %vm1319_vm6, %vm1320_vm4  ;;  %v1326_v41 = vor.u32 1.1754944e-38, %v1325_v38  ;;  %v2749_v43 = vadd.f32 1.0, %v2113_v34  ;;  %vm1324_vm8 = vcmp.eq.f32.partialorder %v1323_v45, 8.507059e+37 }
 0x13c   : > { %v2115_v52 = vpop.eup %2114  ;;  %2120 = vrcp.f32 %v2745_v40  ;;  %v945_v50 = vadd.f32 %v2650_v13, %v809_v46  ;;  %v1518_v3 = vand.u32 2147483647, %v2725_v23  ;;  %v1520_v54 = vand.u32 2147483648, %v2725_v23 }
 0x13d   : > { %v1322_v55 = vsel %vm1321_vm7, %v2107_v27, %v1318_v39  ;;  %v1510_v58 = vmul.f32 %v2115_v52, %v2725_v23  ;;  %2122 = vrcp.f32 %v2749_v43  ;;  %v1293_v56 = vand.u32 2147483647, %v2734_v35 }
 0x13e   : > { %v1327_v61 = vsel %vm1324_vm8, %v1326_v41, %v1322_v55  ;;  %v2117_v1 = vpop.eup %2116  ;;  %vm1515_vm9 = vweird.f32 %v2115_v52  ;;  %v1295_v59 = vand.u32 2147483648, %v2734_v35  ;;  %vm1514_vm10 = vweird.f32 %v2725_v23 }
 0x13f   : > { %1570 = vst [vmem:[%s2333_s19 + $0x80] sm:$0xff] %v1327_v61  ;;  %v1511_v2 = vsub.f32 1.0, %v1510_v58  ;;  %v2119_v44 = vpop.eup %2118  ;;  %v1285_v49 = vmul.f32 %v2117_v1, %v2734_v35  ;;  %v1923_v51 = vmul.f32 -1.442695, %v945_v50  ;;  %vm1519_vm11 = vcmp.eq.f32.partialorder %v1518_v3, 8.507059e+37  ;;  %vm1516_vm12 = vmor %vm1514_vm10, %vm1515_vm9 }
 0x140   : > { %v2761_v5 = vadd.f32 1.0, %v2119_v44  ;;  %v1521_v12 = vor.u32 1.1754944e-38, %v1520_v54  ;;  %vm1289_vm13 = vweird.f32 %v2734_v35  ;;  %vm1290_vm14 = vweird.f32 %v2117_v1 }
 0x141   : > { %v1512_v4 = vmul.f32 %v2115_v52, %v1511_v2  ;;  %v1286_v13 = vsub.f32 1.0, %v1285_v49  ;;  %vm2767_vm15 = vcmp.eq.f32.partialorder %v1293_v56, 8.507059e+37  ;;  %v1296_v60 = vor.u32 1.1754944e-38, %v1295_v59  ;;  %vm1291_vm0 = vmor %vm1289_vm13, %vm1290_vm14 }
 0x142   : > { %v2121_v63 = vpop.eup %2120  ;;  %2124 = vrcp.f32 %v2761_v5  ;;  %v1338_v20 = vand.u32 2147483647, %v2745_v40  ;;  %v1340_v8 = vand.u32 2147483648, %v2745_v40  ;;  %v1533_v22 = vand.u32 2147483647, %v2749_v43 }
 0x143   : > { %v1513_v10 = vadd.f32 %v2115_v52, %v1512_v4  ;;  %v1287_v9 = vmul.f32 %v2117_v1, %v1286_v13  ;;  %v1330_v7 = vmul.f32 %v2121_v63, %v2745_v40  ;;  %v2123_v62 = vpop.eup %2122  ;;  %2126 = vpow2.f32 %v1923_v51 }
 0x144   : > { %v1525_v19 = vmul.f32 %v2123_v62, %v2749_v43  ;;  %vm1335_vm1 = vweird.f32 %v2121_v63  ;;  %vm1334_vm2 = vweird.f32 %v2745_v40  ;;  %v1535_v29 = vand.u32 2147483648, %v2749_v43 }
 0x145   : > { %v1517_v0 = vsel %vm1516_vm12, %v2115_v52, %v1513_v10  ;;  %v1288_v16 = vadd.f32 %v2117_v1, %v1287_v9  ;;  %v1331_v18 = vsub.f32 1.0, %v1330_v7  ;;  %vm1530_vm3 = vweird.f32 %v2123_v62  ;;  %vm1336_vm4 = vmor %vm1334_vm2, %vm1335_vm1 }
 0x146   : > { %v1522_v15 = vsel %vm1519_vm11, %v1521_v12, %v1517_v0  ;;  %v1526_v32 = vsub.f32 1.0, %v1525_v19  ;;  %vm1339_vm5 = vcmp.eq.f32.partialorder %v1338_v20, 8.507059e+37  ;;  %v1341_v53 = vor.u32 1.1754944e-38, %v1340_v8 }
 0x147   : > { %1583 = vst [vmem:[%s2333_s19 + $0xe8] sm:$0xff] %v1522_v15  ;;  %v1292_v25 = vsel %vm1291_vm0, %v2117_v1, %v1288_v16  ;;  %v1332_v27 = vmul.f32 %v2121_v63, %v1331_v18  ;;  %vm1529_vm6 = vweird.f32 %v2749_v43  ;;  %vm1534_vm7 = vcmp.eq.f32.partialorder %v1533_v22, 8.507059e+37 }
 0x148   : > { %v2125_v23 = vpop.eup %2124  ;;  %v1297_v6 = vsel %vm2767_vm15, %v1296_v60, %v1292_v25  ;;  %v1527_v30 = vmul.f32 %v2123_v62, %v1526_v32  ;;  %vm1531_vm8 = vmor %vm1529_vm6, %vm1530_vm3  ;;  %v1536_v24 = vor.u32 1.1754944e-38, %v1535_v29  ;;  %v1308_v38 = vand.u32 2147483647, %v2761_v5 }
 0x149   : > { %1568 = vst [vmem:[%s2333_s19 + $0x70] sm:$0xff] %v1297_v6  ;;  %v1333_v33 = vadd.f32 %v2121_v63, %v1332_v27  ;;  %v1300_v17 = vmul.f32 %v2125_v23, %v2761_v5  ;;  %v2127_v21 = vpop.eup %2126  ;;  %v1310_v57 = vand.u32 2147483648, %v2761_v5  ;;  %vm1305_vm9 = vweird.f32 %v2125_v23 }
 0x14a   : > { %v1528_v31 = vadd.f32 %v2123_v62, %v1527_v30  ;;  %v1073_v36 = vadd.f32 1.0, %v2127_v21  ;;  %vm1304_vm10 = vweird.f32 %v2761_v5  ;;  %vm1309_vm12 = vcmp.eq.f32.partialorder %v1308_v38, 8.507059e+37 }
 0x14b   : > { %v1337_v26 = vsel %vm1336_vm4, %v2121_v63, %v1333_v33  ;;  %v1301_v35 = vsub.f32 1.0, %v1300_v17  ;;  %vm1306_vm11 = vmor %vm1304_vm10, %vm1305_vm9  ;;  %v1311_v47 = vor.u32 1.1754944e-38, %v1310_v57 }
 0x14c   : > { %v1342_v37 = vsel %vm1339_vm5, %v1341_v53, %v1337_v26  ;;  %v1532_v42 = vsel %vm1531_vm8, %v2123_v62, %v1528_v31  ;;  %2128 = vrcp.f32 %v1073_v36  ;;  %v1550_v52 = vand.u32 2147483648, %v1073_v36 }
 0x14d   : > { %1571 = vst [vmem:[%s2333_s19 + $0x88] sm:$0xff] %v1342_v37  ;;  %v1302_v45 = vmul.f32 %v2125_v23, %v1301_v35  ;;  %v1537_v11 = vsel %vm1534_vm7, %v1536_v24, %v1532_v42  ;;  %v1548_v43 = vand.u32 2147483647, %v1073_v36  ;;  %vm1544_vm14 = vweird.f32 %v1073_v36 }
 0x14e   : > { %1584 = vst [vmem:[%s2333_s19 + $0xf0] sm:$0xff] %v1537_v11  ;;  %v1551_v58 = vor.u32 1.1754944e-38, %v1550_v52 }
 0x14f   : > { %v1303_v28 = vadd.f32 %v2125_v23, %v1302_v45  ;;  %vm1549_vm0 = vcmp.eq.f32.partialorder %v1548_v43, 8.507059e+37 }
 0x151   : > { %v1307_v46 = vsel %vm1306_vm11, %v2125_v23, %v1303_v28 }
 0x152   : > { %v1312_v34 = vsel %vm1309_vm12, %v1311_v47, %v1307_v46  ;;  %v2129_v48 = vpop.eup %2128 }
 0x153   : > { %1569 = vst [vmem:[%s2333_s19 + $0x78] sm:$0xff] %v1312_v34  ;;  %v1540_v39 = vmul.f32 %v2129_v48, %v1073_v36  ;;  %vm1545_vm13 = vweird.f32 %v2129_v48 }
 0x154   : > { %vm1546_vm15 = vmor %vm1544_vm14, %vm1545_vm13 }
 0x155   : > { %v1541_v40 = vsub.f32 1.0, %v1540_v39 }
 0x157   : > { %v1542_v41 = vmul.f32 %v2129_v48, %v1541_v40 }
 0x159   : > { %v1543_v55 = vadd.f32 %v2129_v48, %v1542_v41 }
 0x15b   : > { %v1547_v61 = vsel %vm1546_vm15, %v2129_v48, %v1543_v55 }
 0x15c   : > { %v1552_v50 = vsel %vm1549_vm0, %v1551_v58, %v1547_v61 }
 0x15d   : > { %1585 = vst [vmem:[%s2333_s19 + $0xf8] sm:$0xff] %v1552_v50 }
 0x15e PF: > { %s13_s14 = sadd.s32 1, %s2153_s14   ;;  %s2839_s12 = smov %s2149_s13 }
 0x15f   : > { %p10_p5 = scmp.ge.s32.totalorder %s13_s14, 4   ;;  %s2840_s13 = smov %s2842_s15 }
 0x161   :  { %12 = sbr.rel (!%p10_p5) target bundleno = 2 (0x2), region = 76 }

</bundles_post_ra>
